<compile_context>
chip_gen: v6e
topology: v6e:2x2x1
jax: 0.10.0
libtpu: 0.0.40
codegen_flags: <defaults>
</compile_context>

<pallas_src>
import jax
import jax.numpy as jnp
from jax.experimental import pallas as pl
from jax.experimental.pallas import tpu as pltpu


def _round_up(v, m):
    return ((v + m - 1) // m) * m


def _sigmoid(x):
    # Single EUP tanh push instead of jax.nn.sigmoid's exp + reciprocal.
    return 0.5 * (jnp.tanh(0.5 * x) + 1.0)


# --------------------------------------------------------------------------- #
# Kernel 1: one LSTM layer over the whole sequence (branch x batch-tile grid).
# --------------------------------------------------------------------------- #
def _lstm_layer_kernel(x_ref, w_ih_ref, w_hh_ref, b_ref, out_ref, xg_scr):
    """Refs (branch grid dim squeezed away):
         x_ref    (T, Bt, I)      bf16
         w_ih_ref (I, 4*Hp)       bf16  (gate-blocked, zero-padded)
         w_hh_ref (Hp, 4*Hp)      bf16  (gate-blocked, zero-padded)
         b_ref    (1, 4*Hp)       f32   (b_ih + b_hh merged, gate-blocked)
         out_ref  (T, Bt, Hp)     bf16
         xg_scr   (T, Bt, 4*Hp)   f32   scratch
    """
    T, Bt, I = x_ref.shape
    Hp = w_hh_ref.shape[0]

    # Hoisted input projection: ONE large bf16 MXU matmul outside the recurrence.
    # (For very long T this scratch should be chunked over time blocks.)
    xg = jnp.dot(x_ref[...].reshape(T * Bt, I), w_ih_ref[...],
                 preferred_element_type=jnp.float32)            # (T*Bt, 4Hp) f32
    xg_scr[...] = xg.reshape(T, Bt, 4 * Hp) + b_ref[...]        # bias folded once

    def step(t, carry):
        h, c = carry                                            # f32 (Bt, Hp)
        # Only the unavoidable recurrent matmul stays in the serial loop.
        gates = xg_scr[t] + jnp.dot(h.astype(jnp.bfloat16), w_hh_ref[...],
                                    preferred_element_type=jnp.float32)
        # PyTorch gate order: [i | f | g | o], each Hp lanes (lane-aligned slices).
        i_g = _sigmoid(gates[:, 0 * Hp:1 * Hp])
        f_g = _sigmoid(gates[:, 1 * Hp:2 * Hp])
        g_g = jnp.tanh(gates[:, 2 * Hp:3 * Hp])
        o_g = _sigmoid(gates[:, 3 * Hp:4 * Hp])
        c_new = f_g * c + i_g * g_g
        h_new = o_g * jnp.tanh(c_new)
        out_ref[t] = h_new.astype(out_ref.dtype)                # full 128-lane store
        return (h_new, c_new)

    h0 = jnp.zeros((Bt, Hp), jnp.float32)
    c0 = jnp.zeros((Bt, Hp), jnp.float32)
    # Full unroll only for small fixed T; partial unroll avoids vreg spills.
    unroll = True if T <= 16 else 4
    jax.lax.fori_loop(0, T, step, (h0, c0), unroll=unroll)


def _lstm_layer_pallas(x, w_ih, w_hh, bias, b_tile):
    """x: (2, T, B_p, I) bf16 -> (2, T, B_p, Hp) bf16 (both branches, one call)."""
    NB, T, B_p, I = x.shape
    Hp = w_hh.shape[1]
    grid = (NB, B_p // b_tile)

    return pl.pallas_call(
        _lstm_layer_kernel,
        out_shape=jax.ShapeDtypeStruct((NB, T, B_p, Hp), jnp.bfloat16),
        grid_spec=pltpu.PrefetchScalarGridSpec(
            num_scalar_prefetch=0,
            grid=grid,
            in_specs=[
                pl.BlockSpec((None, T, b_tile, I), lambda r, b: (r, 0, b, 0)),
                pl.BlockSpec((None, I, 4 * Hp), lambda r, b: (r, 0, 0)),
                pl.BlockSpec((None, Hp, 4 * Hp), lambda r, b: (r, 0, 0)),
                pl.BlockSpec((None, 1, 4 * Hp), lambda r, b: (r, 0, 0)),
            ],
            out_specs=pl.BlockSpec((None, T, b_tile, Hp), lambda r, b: (r, 0, b, 0)),
            scratch_shapes=[pltpu.VMEM((T, b_tile, 4 * Hp), jnp.float32)],
        ),
        compiler_params=pltpu.CompilerParams(
            # branch axis and batch tiles are independent -> both "parallel"
            dimension_semantics=("parallel", "parallel")),
    )(x, w_ih, w_hh, bias)


# --------------------------------------------------------------------------- #
# Kernel 2: fused fc -> ReLU -> fc1 head, tiled over (branch, row-block) grid.
# --------------------------------------------------------------------------- #
def _fc_head_kernel(lo_ref, fcw_ref, fcb_ref, fc1w_ref, fc1b_ref, out_ref):
    """lo_ref (Nt, Hp) bf16; fcw (Hp, Fp) bf16; fcb (1, Fp) f32;
       fc1w (Fp, Cp) bf16; fc1b (1, Cp) f32; out (Nt, Cp) bf16."""
    h1 = jnp.dot(lo_ref[...], fcw_ref[...],
                 preferred_element_type=jnp.float32) + fcb_ref[...]
    h1 = jnp.maximum(h1, 0.0)
    # TODO(synk): nn.Dropout(p=0.5) here is a training-time op; eval = identity.
    out = jnp.dot(h1.astype(jnp.bfloat16), fc1w_ref[...],
                  preferred_element_type=jnp.float32) + fc1b_ref[...]
    out_ref[...] = out.astype(out_ref.dtype)


def _pick_row_tile(n):
    for cand in (512, 256, 128, 64, 32, 16, 8):
        if n % cand == 0:
            return cand
    return n


def _fc_head_pallas(lo, fcw, fcb, fc1w, fc1b):
    """lo: (2, N, Hp) bf16 -> (2, N, Cp) bf16 with a pipelined row grid."""
    NB, N, Hp = lo.shape
    F_p = fcw.shape[2]
    C_p = fc1w.shape[2]
    row_tile = _pick_row_tile(N)
    grid = (NB, N // row_tile)

    return pl.pallas_call(
        _fc_head_kernel,
        out_shape=jax.ShapeDtypeStruct((NB, N, C_p), jnp.bfloat16),
        grid_spec=pltpu.PrefetchScalarGridSpec(
            num_scalar_prefetch=0,
            grid=grid,
            in_specs=[
                pl.BlockSpec((None, row_tile, Hp), lambda r, n: (r, n, 0)),
                pl.BlockSpec((None, Hp, F_p), lambda r, n: (r, 0, 0)),
                pl.BlockSpec((None, 1, F_p), lambda r, n: (r, 0, 0)),
                pl.BlockSpec((None, F_p, C_p), lambda r, n: (r, 0, 0)),
                pl.BlockSpec((None, 1, C_p), lambda r, n: (r, 0, 0)),
            ],
            out_specs=pl.BlockSpec((None, row_tile, C_p), lambda r, n: (r, n, 0)),
        ),
        compiler_params=pltpu.CompilerParams(
            dimension_semantics=("parallel", "parallel")),
    )(lo, fcw, fcb, fc1w, fc1b)


# --------------------------------------------------------------------------- #
# One-time parameter preparation (hoisted out of the forward path).
# --------------------------------------------------------------------------- #
def _pad_gate_weight(w, H, Hp, in_p):
    """PyTorch weight (4H, in) -> transposed, gate-blocked, zero-padded (in_p, 4*Hp)."""
    w = jnp.asarray(w, jnp.float32)
    in_size = w.shape[1]
    out = jnp.zeros((in_p, 4 * Hp), jnp.float32)
    for g in range(4):
        out = out.at[:in_size, g * Hp:g * Hp + H].set(w[g * H:(g + 1) * H, :].T)
    return out


def _pad_gate_bias(b_ih, b_hh, H, Hp):
    b = jnp.asarray(b_ih, jnp.float32) + jnp.asarray(b_hh, jnp.float32)
    out = jnp.zeros((1, 4 * Hp), jnp.float32)
    for g in range(4):
        out = out.at[0, g * Hp:g * Hp + H].set(b[g * H:(g + 1) * H])
    return out


def prepare_lstm_sep_params(text_params, audio_params):
    """Transpose / gate-block-pad / bf16-cast weights and stack the two branches.
       Call ONCE; the result is reused by every forward call."""
    branches = (text_params, audio_params)
    n_layers = len(text_params[0])
    H = text_params[0][0][1].shape[1]                 # w_hh: (4H, H)
    Hp = _round_up(H, 128)
    I_text = text_params[0][0][0].shape[1]
    I_audio = audio_params[0][0][0].shape[1]
    I_max = max(I_text, I_audio)

    layers = []
    for l in range(n_layers):
        in_p = I_max if l == 0 else Hp
        w_ih_st, w_hh_st, b_st = [], [], []
        for (lstm_layers, _fc_w, _fc_b, _fc1_w, _fc1_b) in branches:
            w_ih, w_hh, b_ih, b_hh = lstm_layers[l]
            w_ih_st.append(_pad_gate_weight(w_ih, H, Hp, in_p).astype(jnp.bfloat16))
            w_hh_st.append(_pad_gate_weight(w_hh, H, Hp, Hp).astype(jnp.bfloat16))
            b_st.append(_pad_gate_bias(b_ih, b_hh, H, Hp))
        layers.append((jnp.stack(w_ih_st), jnp.stack(w_hh_st), jnp.stack(b_st)))

    Fd = text_params[1].shape[0]
    C = text_params[3].shape[0]
    F_p = _round_up(Fd, 128)
    C_p = _round_up(C, 128)
    fcw_st, fcb_st, fc1w_st, fc1b_st = [], [], [], []
    for (_layers, fc_w, fc_b, fc1_w, fc1_b) in branches:
        fcw = jnp.zeros((Hp, F_p), jnp.float32).at[:H, :Fd].set(
            jnp.asarray(fc_w, jnp.float32).T)
        fcb = jnp.zeros((1, F_p), jnp.float32).at[0, :Fd].set(
            jnp.asarray(fc_b, jnp.float32))
        fc1w = jnp.zeros((F_p, C_p), jnp.float32).at[:Fd, :C].set(
            jnp.asarray(fc1_w, jnp.float32).T)
        fc1b = jnp.zeros((1, C_p), jnp.float32).at[0, :C].set(
            jnp.asarray(fc1_b, jnp.float32))
        fcw_st.append(fcw.astype(jnp.bfloat16))
        fcb_st.append(fcb)
        fc1w_st.append(fc1w.astype(jnp.bfloat16))
        fc1b_st.append(fc1b)
    head = (jnp.stack(fcw_st), jnp.stack(fcb_st),
            jnp.stack(fc1w_st), jnp.stack(fc1b_st))

    meta = dict(H=H, Hp=Hp, Fd=Fd, C=C, C_p=C_p,
                I_text=I_text, I_audio=I_audio, I_max=I_max, n_layers=n_layers)
    return dict(layers=layers, head=head, meta=meta)


# --------------------------------------------------------------------------- #
# LSTMSep.forward (eval-mode semantics), both branches fused for 2-TC chips.
# --------------------------------------------------------------------------- #
def lstm_sep_forward(text, audio, prepared):
    """text: (B, T, I_text) f32; audio: (B, T, I_audio) f32.
       Returns (text_out, audio_out), each (B*T, n_classes) f32."""
    meta = prepared["meta"]
    B, T, _ = text.shape
    # Fused path assumes both modalities share (B, T); the demo/module use that.
    assert audio.shape[:2] == (B, T), "fused branches require matching (B, T)"
    Hp, C, C_p = meta["Hp"], meta["C"], meta["C_p"]

    # Batch tile: sublane-aligned; branch grid axis already gives >=2 grid steps,
    # so a large batch tile amortizes per-step costs on single-TC chips too.
    b_tile = min(256, _round_up(B, 8))
    B_p = _round_up(B, b_tile)

    # (branch, T, B, I) layout: leading-axis time index -> full-tile loads/stores.
    x = jnp.zeros((2, T, B_p, meta["I_max"]), jnp.float32)
    x = x.at[0, :, :B, :meta["I_text"]].set(jnp.transpose(text, (1, 0, 2)))
    x = x.at[1, :, :B, :meta["I_audio"]].set(jnp.transpose(audio, (1, 0, 2)))
    cur = x.astype(jnp.bfloat16)

    for (w_ih, w_hh, bias) in prepared["layers"]:
        cur = _lstm_layer_pallas(cur, w_ih, w_hh, bias, b_tile)   # (2, T, B_p, Hp)
        # TODO(synk): nn.LSTM inter-layer dropout (p=0.5) is train-only; eval = identity.

    lo = cur.reshape(2, T * B_p, Hp)                              # (2, N, Hp) bf16
    out_p = _fc_head_pallas(lo, *prepared["head"])                # (2, N, Cp) bf16

    # Reorder rows to match PyTorch's out.contiguous().view(-1, H): (b-major, t),
    # slice off batch / class padding and cast back to f32.
    out_btc = (out_p.reshape(2, T, B_p, C_p)
                    .transpose(0, 2, 1, 3)[:, :B, :, :C]
                    .reshape(2, B * T, C)
                    .astype(jnp.float32))
    return out_btc[0], out_btc[1]


# --------------------------------------------------------------------------- #
# Pure-JAX reference (eval-mode PyTorch semantics) for a sanity check.
# --------------------------------------------------------------------------- #
def _branch_ref(x, lstm_layers, fc_w, fc_b, fc1_w, fc1_b):
    B, T, _ = x.shape
    out = x
    for (w_ih, w_hh, b_ih, b_hh) in lstm_layers:
        H = w_hh.shape[1]
        h = jnp.zeros((B, H), jnp.float32)
        c = jnp.zeros((B, H), jnp.float32)
        hs = []
        for t in range(T):
            g = out[:, t, :] @ w_ih.T + b_ih + h @ w_hh.T + b_hh
            i_g = jax.nn.sigmoid(g[:, 0 * H:1 * H])
            f_g = jax.nn.sigmoid(g[:, 1 * H:2 * H])
            g_g = jnp.tanh(g[:, 2 * H:3 * H])
            o_g = jax.nn.sigmoid(g[:, 3 * H:4 * H])
            c = f_g * c + i_g * g_g
            h = o_g * jnp.tanh(c)
            hs.append(h)
        out = jnp.stack(hs, axis=1)
    flat = out.reshape(-1, out.shape[-1])
    h1 = jnp.maximum(flat @ fc_w.T + fc_b, 0.0)
    return h1 @ fc1_w.T + fc1_b


# --------------------------------------------------------------------------- #
if __name__ == "__main__":
    B, T, H, FC_DIM, C, N_LAYERS = 2, 8, 32, 32, 4, 2
    I_TEXT, I_AUDIO = 16, 8

    def make_branch_params(key, input_size):
        ks = iter(jax.random.split(key, 4 * N_LAYERS + 4))
        k = 1.0 / jnp.sqrt(jnp.float32(H))
        layers = []
        in_sz = input_size
        for _ in range(N_LAYERS):
            w_ih = jax.random.uniform(next(ks), (4 * H, in_sz), jnp.float32, -k, k)
            w_hh = jax.random.uniform(next(ks), (4 * H, H), jnp.float32, -k, k)
            b_ih = jax.random.uniform(next(ks), (4 * H,), jnp.float32, -k, k)
            b_hh = jax.random.uniform(next(ks), (4 * H,), jnp.float32, -k, k)
            layers.append((w_ih, w_hh, b_ih, b_hh))
            in_sz = H
        fc_w = jax.random.uniform(next(ks), (FC_DIM, H), jnp.float32, -k, k)
        fc_b = jax.random.uniform(next(ks), (FC_DIM,), jnp.float32, -k, k)
        k1 = 1.0 / jnp.sqrt(jnp.float32(FC_DIM))
        fc1_w = jax.random.uniform(next(ks), (C, FC_DIM), jnp.float32, -k1, k1)
        fc1_b = jax.random.uniform(next(ks), (C,), jnp.float32, -k1, k1)
        return layers, fc_w, fc_b, fc1_w, fc1_b

    key = jax.random.PRNGKey(0)
    k_text, k_audio, k_x = jax.random.split(key, 3)
    text_params = make_branch_params(k_text, I_TEXT)
    audio_params = make_branch_params(k_audio, I_AUDIO)

    kx1, kx2 = jax.random.split(k_x)
    text = jax.random.normal(kx1, (B, T, I_TEXT), jnp.float32)
    audio = jax.random.normal(kx2, (B, T, I_AUDIO), jnp.float32)

    # One-time weight prep (hoisted out of the forward path).
    prepared = prepare_lstm_sep_params(text_params, audio_params)

    text_out, audio_out = lstm_sep_forward(text, audio, prepared)
    text_out = jax.block_until_ready(text_out)
    audio_out = jax.block_until_ready(audio_out)

    text_ref = _branch_ref(text, *text_params)
    audio_ref = _branch_ref(audio, *audio_params)

    assert text_out.shape == (B * T, C) and audio_out.shape == (B * T, C)
    # bf16 MXU operands + bf16 head output -> loosened tolerance vs f32 reference.
    assert jnp.allclose(text_out, text_ref, rtol=3e-2, atol=3e-2), "text mismatch"
    assert jnp.allclose(audio_out, audio_ref, rtol=3e-2, atol=3e-2), "audio mismatch"

    print("KERNEL_OK")
</pallas_src>

<mosaic_0001>
module attributes {stable_mosaic.version = 11 : i64} {
  func.func @_lstm_layer_kernel(%arg0: i32, %arg1: i32, %arg2: memref<1x8x8x16xbf16, #tpu.memory_space<vmem>>, %arg3: memref<1x16x512xbf16, #tpu.memory_space<vmem>>, %arg4: memref<1x128x512xbf16, #tpu.memory_space<vmem>>, %arg5: memref<1x1x512xf32, #tpu.memory_space<vmem>>, %arg6: memref<1x8x8x128xbf16, #tpu.memory_space<vmem>>, %arg7: memref<8x8x512xf32, #tpu.memory_space<vmem>>) attributes {dimension_semantics = [#tpu.dimension_semantics<parallel>, #tpu.dimension_semantics<parallel>], iteration_bounds = array<i64: 2, 1>, scalar_prefetch = 0 : i64, scratch_operands = 1 : i64, tpu.core_type = #tpu.core_type<tc>, window_params = [{transform_indices = @transform_0, window_bounds = array<i64: 1, 8, 8, 16>}, {transform_indices = @transform_1, window_bounds = array<i64: 1, 16, 512>}, {transform_indices = @transform_2, window_bounds = array<i64: 1, 128, 512>}, {transform_indices = @transform_3, window_bounds = array<i64: 1, 1, 512>}, {transform_indices = @transform_4, window_bounds = array<i64: 1, 8, 8, 128>}]} {
    %c0 = arith.constant 0 : index
    %c0_0 = arith.constant 0 : index
    %c0_1 = arith.constant 0 : index
    %c0_2 = arith.constant 0 : index
    %0 = vector.load %arg2[%c0, %c0_0, %c0_1, %c0_2] : memref<1x8x8x16xbf16, #tpu.memory_space<vmem>>, vector<1x8x8x16xbf16>
    %1 = vector.shape_cast %0 : vector<1x8x8x16xbf16> to vector<8x8x16xbf16>
    %2 = vector.shape_cast %1 : vector<8x8x16xbf16> to vector<64x16xbf16>
    %c0_3 = arith.constant 0 : index
    %c0_4 = arith.constant 0 : index
    %c0_5 = arith.constant 0 : index
    %3 = vector.load %arg3[%c0_3, %c0_4, %c0_5] : memref<1x16x512xbf16, #tpu.memory_space<vmem>>, vector<1x16x512xbf16>
    %4 = vector.shape_cast %3 : vector<1x16x512xbf16> to vector<16x512xbf16>
    %cst = arith.constant dense<0.000000e+00> : vector<64x512xf32>
    %5 = tpu.matmul %2, %4, %cst {dimension_numbers = #tpu.dot_dimension_numbers<[1], [0], [0], [1], [0, 0, 1, 1], [], []>} : vector<64x16xbf16>, vector<16x512xbf16>, vector<64x512xf32> -> vector<64x512xf32>
    %6 = vector.shape_cast %5 : vector<64x512xf32> to vector<8x8x512xf32>
    %c0_6 = arith.constant 0 : index
    %c0_7 = arith.constant 0 : index
    %c0_8 = arith.constant 0 : index
    %7 = vector.load %arg5[%c0_6, %c0_7, %c0_8] : memref<1x1x512xf32, #tpu.memory_space<vmem>>, vector<1x1x512xf32>
    %8 = vector.shape_cast %7 : vector<1x1x512xf32> to vector<1x512xf32>
    %9 = vector.shape_cast %8 : vector<1x512xf32> to vector<1x1x512xf32>
    %10 = vector.broadcast %9 : vector<1x1x512xf32> to vector<8x8x512xf32>
    %11 = arith.addf %6, %10 : vector<8x8x512xf32>
    %c0_9 = arith.constant 0 : index
    %c0_10 = arith.constant 0 : index
    %c0_11 = arith.constant 0 : index
    %12 = vector.load %arg7[%c0_9, %c0_10, %c0_11] : memref<8x8x512xf32, #tpu.memory_space<vmem>>, vector<8x8x512xf32>
    tpu.vector_store %arg7[%c0_9, %c0_10, %c0_11], %11 {strides = array<i32>} : memref<8x8x512xf32, #tpu.memory_space<vmem>>, vector<8x8x512xf32>,
    %cst_12 = arith.constant 0.000000e+00 : f32
    %13 = vector.broadcast %cst_12 : f32 to vector<8x128xf32>
    %cst_13 = arith.constant 0.000000e+00 : f32
    %14 = vector.broadcast %cst_13 : f32 to vector<8x128xf32>
    %c0_i32 = arith.constant 0 : i32
    %15 = arith.index_cast %c0_i32 : i32 to index
    %c0_14 = arith.constant 0 : index
    %c0_15 = arith.constant 0 : index
    %16 = vector.load %arg7[%15, %c0_14, %c0_15] : memref<8x8x512xf32, #tpu.memory_space<vmem>>, vector<1x8x512xf32>
    %17 = vector.shape_cast %16 : vector<1x8x512xf32> to vector<8x512xf32>
    %18 = arith.truncf %13 : vector<8x128xf32> to vector<8x128xbf16>
    %c0_16 = arith.constant 0 : index
    %c0_17 = arith.constant 0 : index
    %c0_18 = arith.constant 0 : index
    %19 = vector.load %arg4[%c0_16, %c0_17, %c0_18] : memref<1x128x512xbf16, #tpu.memory_space<vmem>>, vector<1x128x512xbf16>
    %20 = vector.shape_cast %19 : vector<1x128x512xbf16> to vector<128x512xbf16>
    %cst_19 = arith.constant dense<0.000000e+00> : vector<8x512xf32>
    %21 = tpu.matmul %18, %20, %cst_19 {dimension_numbers = #tpu.dot_dimension_numbers<[1], [0], [0], [1], [0, 0, 1, 1], [], []>} : vector<8x128xbf16>, vector<128x512xbf16>, vector<8x512xf32> -> vector<8x512xf32>
    %22 = arith.addf %17, %21 : vector<8x512xf32>
    %23 = vector.extract_strided_slice %22 {offsets = [0, 0], sizes = [8, 128], strides = [1, 1]} : vector<8x512xf32> to vector<8x128xf32>
    %cst_20 = arith.constant 5.000000e-01 : f32
    %24 = vector.broadcast %cst_20 : f32 to vector<8x128xf32>
    %25 = arith.mulf %24, %23 : vector<8x128xf32>
    %26 = math.tanh %25 : vector<8x128xf32>
    %cst_21 = arith.constant 1.000000e+00 : f32
    %27 = vector.broadcast %cst_21 : f32 to vector<8x128xf32>
    %28 = arith.addf %26, %27 : vector<8x128xf32>
    %cst_22 = arith.constant 5.000000e-01 : f32
    %29 = vector.broadcast %cst_22 : f32 to vector<8x128xf32>
    %30 = arith.mulf %29, %28 : vector<8x128xf32>
    %31 = vector.extract_strided_slice %22 {offsets = [0, 128], sizes = [8, 128], strides = [1, 1]} : vector<8x512xf32> to vector<8x128xf32>
    %cst_23 = arith.constant 5.000000e-01 : f32
    %32 = vector.broadcast %cst_23 : f32 to vector<8x128xf32>
    %33 = arith.mulf %32, %31 : vector<8x128xf32>
    %34 = math.tanh %33 : vector<8x128xf32>
    %cst_24 = arith.constant 1.000000e+00 : f32
    %35 = vector.broadcast %cst_24 : f32 to vector<8x128xf32>
    %36 = arith.addf %34, %35 : vector<8x128xf32>
    %cst_25 = arith.constant 5.000000e-01 : f32
    %37 = vector.broadcast %cst_25 : f32 to vector<8x128xf32>
    %38 = arith.mulf %37, %36 : vector<8x128xf32>
    %39 = vector.extract_strided_slice %22 {offsets = [0, 256], sizes = [8, 128], strides = [1, 1]} : vector<8x512xf32> to vector<8x128xf32>
    %40 = math.tanh %39 : vector<8x128xf32>
    %41 = vector.extract_strided_slice %22 {offsets = [0, 384], sizes = [8, 128], strides = [1, 1]} : vector<8x512xf32> to vector<8x128xf32>
    %cst_26 = arith.constant 5.000000e-01 : f32
    %42 = vector.broadcast %cst_26 : f32 to vector<8x128xf32>
    %43 = arith.mulf %42, %41 : vector<8x128xf32>
    %44 = math.tanh %43 : vector<8x128xf32>
    %cst_27 = arith.constant 1.000000e+00 : f32
    %45 = vector.broadcast %cst_27 : f32 to vector<8x128xf32>
    %46 = arith.addf %44, %45 : vector<8x128xf32>
    %cst_28 = arith.constant 5.000000e-01 : f32
    %47 = vector.broadcast %cst_28 : f32 to vector<8x128xf32>
    %48 = arith.mulf %47, %46 : vector<8x128xf32>
    %49 = arith.mulf %38, %14 : vector<8x128xf32>
    %50 = arith.mulf %30, %40 : vector<8x128xf32>
    %51 = arith.addf %49, %50 : vector<8x128xf32>
    %52 = math.tanh %51 : vector<8x128xf32>
    %53 = arith.mulf %48, %52 : vector<8x128xf32>
    %54 = arith.truncf %53 : vector<8x128xf32> to vector<8x128xbf16>
    %c0_29 = arith.constant 0 : index
    %55 = arith.index_cast %c0_i32 : i32 to index
    %c0_30 = arith.constant 0 : index
    %c0_31 = arith.constant 0 : index
    %56 = vector.load %arg6[%c0_29, %55, %c0_30, %c0_31] : memref<1x8x8x128xbf16, #tpu.memory_space<vmem>>, vector<1x1x8x128xbf16>
    %57 = vector.shape_cast %56 : vector<1x1x8x128xbf16> to vector<8x128xbf16>
    %58 = vector.shape_cast %54 : vector<8x128xbf16> to vector<1x1x8x128xbf16>
    tpu.vector_store %arg6[%c0_29, %55, %c0_30, %c0_31], %58 {strides = array<i32>} : memref<1x8x8x128xbf16, #tpu.memory_space<vmem>>, vector<1x1x8x128xbf16>,
    %c1_i32 = arith.constant 1 : i32
    %59 = arith.index_cast %c1_i32 : i32 to index
    %c0_32 = arith.constant 0 : index
    %c0_33 = arith.constant 0 : index
    %60 = vector.load %arg7[%59, %c0_32, %c0_33] : memref<8x8x512xf32, #tpu.memory_space<vmem>>, vector<1x8x512xf32>
    %61 = vector.shape_cast %60 : vector<1x8x512xf32> to vector<8x512xf32>
    %62 = arith.truncf %53 : vector<8x128xf32> to vector<8x128xbf16>
    %c0_34 = arith.constant 0 : index
    %c0_35 = arith.constant 0 : index
    %c0_36 = arith.constant 0 : index
    %63 = vector.load %arg4[%c0_34, %c0_35, %c0_36] : memref<1x128x512xbf16, #tpu.memory_space<vmem>>, vector<1x128x512xbf16>
    %64 = vector.shape_cast %63 : vector<1x128x512xbf16> to vector<128x512xbf16>
    %cst_37 = arith.constant dense<0.000000e+00> : vector<8x512xf32>
    %65 = tpu.matmul %62, %64, %cst_37 {dimension_numbers = #tpu.dot_dimension_numbers<[1], [0], [0], [1], [0, 0, 1, 1], [], []>} : vector<8x128xbf16>, vector<128x512xbf16>, vector<8x512xf32> -> vector<8x512xf32>
    %66 = arith.addf %61, %65 : vector<8x512xf32>
    %67 = vector.extract_strided_slice %66 {offsets = [0, 0], sizes = [8, 128], strides = [1, 1]} : vector<8x512xf32> to vector<8x128xf32>
    %cst_38 = arith.constant 5.000000e-01 : f32
    %68 = vector.broadcast %cst_38 : f32 to vector<8x128xf32>
    %69 = arith.mulf %68, %67 : vector<8x128xf32>
    %70 = math.tanh %69 : vector<8x128xf32>
    %cst_39 = arith.constant 1.000000e+00 : f32
    %71 = vector.broadcast %cst_39 : f32 to vector<8x128xf32>
    %72 = arith.addf %70, %71 : vector<8x128xf32>
    %cst_40 = arith.constant 5.000000e-01 : f32
    %73 = vector.broadcast %cst_40 : f32 to vector<8x128xf32>
    %74 = arith.mulf %73, %72 : vector<8x128xf32>
    %75 = vector.extract_strided_slice %66 {offsets = [0, 128], sizes = [8, 128], strides = [1, 1]} : vector<8x512xf32> to vector<8x128xf32>
    %cst_41 = arith.constant 5.000000e-01 : f32
    %76 = vector.broadcast %cst_41 : f32 to vector<8x128xf32>
    %77 = arith.mulf %76, %75 : vector<8x128xf32>
    %78 = math.tanh %77 : vector<8x128xf32>
    %cst_42 = arith.constant 1.000000e+00 : f32
    %79 = vector.broadcast %cst_42 : f32 to vector<8x128xf32>
    %80 = arith.addf %78, %79 : vector<8x128xf32>
    %cst_43 = arith.constant 5.000000e-01 : f32
    %81 = vector.broadcast %cst_43 : f32 to vector<8x128xf32>
    %82 = arith.mulf %81, %80 : vector<8x128xf32>
    %83 = vector.extract_strided_slice %66 {offsets = [0, 256], sizes = [8, 128], strides = [1, 1]} : vector<8x512xf32> to vector<8x128xf32>
    %84 = math.tanh %83 : vector<8x128xf32>
    %85 = vector.extract_strided_slice %66 {offsets = [0, 384], sizes = [8, 128], strides = [1, 1]} : vector<8x512xf32> to vector<8x128xf32>
    %cst_44 = arith.constant 5.000000e-01 : f32
    %86 = vector.broadcast %cst_44 : f32 to vector<8x128xf32>
    %87 = arith.mulf %86, %85 : vector<8x128xf32>
    %88 = math.tanh %87 : vector<8x128xf32>
    %cst_45 = arith.constant 1.000000e+00 : f32
    %89 = vector.broadcast %cst_45 : f32 to vector<8x128xf32>
    %90 = arith.addf %88, %89 : vector<8x128xf32>
    %cst_46 = arith.constant 5.000000e-01 : f32
    %91 = vector.broadcast %cst_46 : f32 to vector<8x128xf32>
    %92 = arith.mulf %91, %90 : vector<8x128xf32>
    %93 = arith.mulf %82, %51 : vector<8x128xf32>
    %94 = arith.mulf %74, %84 : vector<8x128xf32>
    %95 = arith.addf %93, %94 : vector<8x128xf32>
    %96 = math.tanh %95 : vector<8x128xf32>
    %97 = arith.mulf %92, %96 : vector<8x128xf32>
    %98 = arith.truncf %97 : vector<8x128xf32> to vector<8x128xbf16>
    %c0_47 = arith.constant 0 : index
    %99 = arith.index_cast %c1_i32 : i32 to index
    %c0_48 = arith.constant 0 : index
    %c0_49 = arith.constant 0 : index
    %100 = vector.load %arg6[%c0_47, %99, %c0_48, %c0_49] : memref<1x8x8x128xbf16, #tpu.memory_space<vmem>>, vector<1x1x8x128xbf16>
    %101 = vector.shape_cast %100 : vector<1x1x8x128xbf16> to vector<8x128xbf16>
    %102 = vector.shape_cast %98 : vector<8x128xbf16> to vector<1x1x8x128xbf16>
    tpu.vector_store %arg6[%c0_47, %99, %c0_48, %c0_49], %102 {strides = array<i32>} : memref<1x8x8x128xbf16, #tpu.memory_space<vmem>>, vector<1x1x8x128xbf16>,
    %c2_i32 = arith.constant 2 : i32
    %103 = arith.index_cast %c2_i32 : i32 to index
    %c0_50 = arith.constant 0 : index
    %c0_51 = arith.constant 0 : index
    %104 = vector.load %arg7[%103, %c0_50, %c0_51] : memref<8x8x512xf32, #tpu.memory_space<vmem>>, vector<1x8x512xf32>
    %105 = vector.shape_cast %104 : vector<1x8x512xf32> to vector<8x512xf32>
    %106 = arith.truncf %97 : vector<8x128xf32> to vector<8x128xbf16>
    %c0_52 = arith.constant 0 : index
    %c0_53 = arith.constant 0 : index
    %c0_54 = arith.constant 0 : index
    %107 = vector.load %arg4[%c0_52, %c0_53, %c0_54] : memref<1x128x512xbf16, #tpu.memory_space<vmem>>, vector<1x128x512xbf16>
    %108 = vector.shape_cast %107 : vector<1x128x512xbf16> to vector<128x512xbf16>
    %cst_55 = arith.constant dense<0.000000e+00> : vector<8x512xf32>
    %109 = tpu.matmul %106, %108, %cst_55 {dimension_numbers = #tpu.dot_dimension_numbers<[1], [0], [0], [1], [0, 0, 1, 1], [], []>} : vector<8x128xbf16>, vector<128x512xbf16>, vector<8x512xf32> -> vector<8x512xf32>
    %110 = arith.addf %105, %109 : vector<8x512xf32>
    %111 = vector.extract_strided_slice %110 {offsets = [0, 0], sizes = [8, 128], strides = [1, 1]} : vector<8x512xf32> to vector<8x128xf32>
    %cst_56 = arith.constant 5.000000e-01 : f32
    %112 = vector.broadcast %cst_56 : f32 to vector<8x128xf32>
    %113 = arith.mulf %112, %111 : vector<8x128xf32>
    %114 = math.tanh %113 : vector<8x128xf32>
    %cst_57 = arith.constant 1.000000e+00 : f32
    %115 = vector.broadcast %cst_57 : f32 to vector<8x128xf32>
    %116 = arith.addf %114, %115 : vector<8x128xf32>
    %cst_58 = arith.constant 5.000000e-01 : f32
    %117 = vector.broadcast %cst_58 : f32 to vector<8x128xf32>
    %118 = arith.mulf %117, %116 : vector<8x128xf32>
    %119 = vector.extract_strided_slice %110 {offsets = [0, 128], sizes = [8, 128], strides = [1, 1]} : vector<8x512xf32> to vector<8x128xf32>
    %cst_59 = arith.constant 5.000000e-01 : f32
    %120 = vector.broadcast %cst_59 : f32 to vector<8x128xf32>
    %121 = arith.mulf %120, %119 : vector<8x128xf32>
    %122 = math.tanh %121 : vector<8x128xf32>
    %cst_60 = arith.constant 1.000000e+00 : f32
    %123 = vector.broadcast %cst_60 : f32 to vector<8x128xf32>
    %124 = arith.addf %122, %123 : vector<8x128xf32>
    %cst_61 = arith.constant 5.000000e-01 : f32
    %125 = vector.broadcast %cst_61 : f32 to vector<8x128xf32>
    %126 = arith.mulf %125, %124 : vector<8x128xf32>
    %127 = vector.extract_strided_slice %110 {offsets = [0, 256], sizes = [8, 128], strides = [1, 1]} : vector<8x512xf32> to vector<8x128xf32>
    %128 = math.tanh %127 : vector<8x128xf32>
    %129 = vector.extract_strided_slice %110 {offsets = [0, 384], sizes = [8, 128], strides = [1, 1]} : vector<8x512xf32> to vector<8x128xf32>
    %cst_62 = arith.constant 5.000000e-01 : f32
    %130 = vector.broadcast %cst_62 : f32 to vector<8x128xf32>
    %131 = arith.mulf %130, %129 : vector<8x128xf32>
    %132 = math.tanh %131 : vector<8x128xf32>
    %cst_63 = arith.constant 1.000000e+00 : f32
    %133 = vector.broadcast %cst_63 : f32 to vector<8x128xf32>
    %134 = arith.addf %132, %133 : vector<8x128xf32>
    %cst_64 = arith.constant 5.000000e-01 : f32
    %135 = vector.broadcast %cst_64 : f32 to vector<8x128xf32>
    %136 = arith.mulf %135, %134 : vector<8x128xf32>
    %137 = arith.mulf %126, %95 : vector<8x128xf32>
    %138 = arith.mulf %118, %128 : vector<8x128xf32>
    %139 = arith.addf %137, %138 : vector<8x128xf32>
    %140 = math.tanh %139 : vector<8x128xf32>
    %141 = arith.mulf %136, %140 : vector<8x128xf32>
    %142 = arith.truncf %141 : vector<8x128xf32> to vector<8x128xbf16>
    %c0_65 = arith.constant 0 : index
    %143 = arith.index_cast %c2_i32 : i32 to index
    %c0_66 = arith.constant 0 : index
    %c0_67 = arith.constant 0 : index
    %144 = vector.load %arg6[%c0_65, %143, %c0_66, %c0_67] : memref<1x8x8x128xbf16, #tpu.memory_space<vmem>>, vector<1x1x8x128xbf16>
    %145 = vector.shape_cast %144 : vector<1x1x8x128xbf16> to vector<8x128xbf16>
    %146 = vector.shape_cast %142 : vector<8x128xbf16> to vector<1x1x8x128xbf16>
    tpu.vector_store %arg6[%c0_65, %143, %c0_66, %c0_67], %146 {strides = array<i32>} : memref<1x8x8x128xbf16, #tpu.memory_space<vmem>>, vector<1x1x8x128xbf16>,
    %c3_i32 = arith.constant 3 : i32
    %147 = arith.index_cast %c3_i32 : i32 to index
    %c0_68 = arith.constant 0 : index
    %c0_69 = arith.constant 0 : index
    %148 = vector.load %arg7[%147, %c0_68, %c0_69] : memref<8x8x512xf32, #tpu.memory_space<vmem>>, vector<1x8x512xf32>
    %149 = vector.shape_cast %148 : vector<1x8x512xf32> to vector<8x512xf32>
    %150 = arith.truncf %141 : vector<8x128xf32> to vector<8x128xbf16>
    %c0_70 = arith.constant 0 : index
    %c0_71 = arith.constant 0 : index
    %c0_72 = arith.constant 0 : index
    %151 = vector.load %arg4[%c0_70, %c0_71, %c0_72] : memref<1x128x512xbf16, #tpu.memory_space<vmem>>, vector<1x128x512xbf16>
    %152 = vector.shape_cast %151 : vector<1x128x512xbf16> to vector<128x512xbf16>
    %cst_73 = arith.constant dense<0.000000e+00> : vector<8x512xf32>
    %153 = tpu.matmul %150, %152, %cst_73 {dimension_numbers = #tpu.dot_dimension_numbers<[1], [0], [0], [1], [0, 0, 1, 1], [], []>} : vector<8x128xbf16>, vector<128x512xbf16>, vector<8x512xf32> -> vector<8x512xf32>
    %154 = arith.addf %149, %153 : vector<8x512xf32>
    %155 = vector.extract_strided_slice %154 {offsets = [0, 0], sizes = [8, 128], strides = [1, 1]} : vector<8x512xf32> to vector<8x128xf32>
    %cst_74 = arith.constant 5.000000e-01 : f32
    %156 = vector.broadcast %cst_74 : f32 to vector<8x128xf32>
    %157 = arith.mulf %156, %155 : vector<8x128xf32>
    %158 = math.tanh %157 : vector<8x128xf32>
    %cst_75 = arith.constant 1.000000e+00 : f32
    %159 = vector.broadcast %cst_75 : f32 to vector<8x128xf32>
    %160 = arith.addf %158, %159 : vector<8x128xf32>
    %cst_76 = arith.constant 5.000000e-01 : f32
    %161 = vector.broadcast %cst_76 : f32 to vector<8x128xf32>
    %162 = arith.mulf %161, %160 : vector<8x128xf32>
    %163 = vector.extract_strided_slice %154 {offsets = [0, 128], sizes = [8, 128], strides = [1, 1]} : vector<8x512xf32> to vector<8x128xf32>
    %cst_77 = arith.constant 5.000000e-01 : f32
    %164 = vector.broadcast %cst_77 : f32 to vector<8x128xf32>
    %165 = arith.mulf %164, %163 : vector<8x128xf32>
    %166 = math.tanh %165 : vector<8x128xf32>
    %cst_78 = arith.constant 1.000000e+00 : f32
    %167 = vector.broadcast %cst_78 : f32 to vector<8x128xf32>
    %168 = arith.addf %166, %167 : vector<8x128xf32>
    %cst_79 = arith.constant 5.000000e-01 : f32
    %169 = vector.broadcast %cst_79 : f32 to vector<8x128xf32>
    %170 = arith.mulf %169, %168 : vector<8x128xf32>
    %171 = vector.extract_strided_slice %154 {offsets = [0, 256], sizes = [8, 128], strides = [1, 1]} : vector<8x512xf32> to vector<8x128xf32>
    %172 = math.tanh %171 : vector<8x128xf32>
    %173 = vector.extract_strided_slice %154 {offsets = [0, 384], sizes = [8, 128], strides = [1, 1]} : vector<8x512xf32> to vector<8x128xf32>
    %cst_80 = arith.constant 5.000000e-01 : f32
    %174 = vector.broadcast %cst_80 : f32 to vector<8x128xf32>
    %175 = arith.mulf %174, %173 : vector<8x128xf32>
    %176 = math.tanh %175 : vector<8x128xf32>
    %cst_81 = arith.constant 1.000000e+00 : f32
    %177 = vector.broadcast %cst_81 : f32 to vector<8x128xf32>
    %178 = arith.addf %176, %177 : vector<8x128xf32>
    %cst_82 = arith.constant 5.000000e-01 : f32
    %179 = vector.broadcast %cst_82 : f32 to vector<8x128xf32>
    %180 = arith.mulf %179, %178 : vector<8x128xf32>
    %181 = arith.mulf %170, %139 : vector<8x128xf32>
    %182 = arith.mulf %162, %172 : vector<8x128xf32>
    %183 = arith.addf %181, %182 : vector<8x128xf32>
    %184 = math.tanh %183 : vector<8x128xf32>
    %185 = arith.mulf %180, %184 : vector<8x128xf32>
    %186 = arith.truncf %185 : vector<8x128xf32> to vector<8x128xbf16>
    %c0_83 = arith.constant 0 : index
    %187 = arith.index_cast %c3_i32 : i32 to index
    %c0_84 = arith.constant 0 : index
    %c0_85 = arith.constant 0 : index
    %188 = vector.load %arg6[%c0_83, %187, %c0_84, %c0_85] : memref<1x8x8x128xbf16, #tpu.memory_space<vmem>>, vector<1x1x8x128xbf16>
    %189 = vector.shape_cast %188 : vector<1x1x8x128xbf16> to vector<8x128xbf16>
    %190 = vector.shape_cast %186 : vector<8x128xbf16> to vector<1x1x8x128xbf16>
    tpu.vector_store %arg6[%c0_83, %187, %c0_84, %c0_85], %190 {strides = array<i32>} : memref<1x8x8x128xbf16, #tpu.memory_space<vmem>>, vector<1x1x8x128xbf16>,
    %c4_i32 = arith.constant 4 : i32
    %191 = arith.index_cast %c4_i32 : i32 to index
    %c0_86 = arith.constant 0 : index
    %c0_87 = arith.constant 0 : index
    %192 = vector.load %arg7[%191, %c0_86, %c0_87] : memref<8x8x512xf32, #tpu.memory_space<vmem>>, vector<1x8x512xf32>
    %193 = vector.shape_cast %192 : vector<1x8x512xf32> to vector<8x512xf32>
    %194 = arith.truncf %185 : vector<8x128xf32> to vector<8x128xbf16>
    %c0_88 = arith.constant 0 : index
    %c0_89 = arith.constant 0 : index
    %c0_90 = arith.constant 0 : index
    %195 = vector.load %arg4[%c0_88, %c0_89, %c0_90] : memref<1x128x512xbf16, #tpu.memory_space<vmem>>, vector<1x128x512xbf16>
    %196 = vector.shape_cast %195 : vector<1x128x512xbf16> to vector<128x512xbf16>
    %cst_91 = arith.constant dense<0.000000e+00> : vector<8x512xf32>
    %197 = tpu.matmul %194, %196, %cst_91 {dimension_numbers = #tpu.dot_dimension_numbers<[1], [0], [0], [1], [0, 0, 1, 1], [], []>} : vector<8x128xbf16>, vector<128x512xbf16>, vector<8x512xf32> -> vector<8x512xf32>
    %198 = arith.addf %193, %197 : vector<8x512xf32>
    %199 = vector.extract_strided_slice %198 {offsets = [0, 0], sizes = [8, 128], strides = [1, 1]} : vector<8x512xf32> to vector<8x128xf32>
    %cst_92 = arith.constant 5.000000e-01 : f32
    %200 = vector.broadcast %cst_92 : f32 to vector<8x128xf32>
    %201 = arith.mulf %200, %199 : vector<8x128xf32>
    %202 = math.tanh %201 : vector<8x128xf32>
    %cst_93 = arith.constant 1.000000e+00 : f32
    %203 = vector.broadcast %cst_93 : f32 to vector<8x128xf32>
    %204 = arith.addf %202, %203 : vector<8x128xf32>
    %cst_94 = arith.constant 5.000000e-01 : f32
    %205 = vector.broadcast %cst_94 : f32 to vector<8x128xf32>
    %206 = arith.mulf %205, %204 : vector<8x128xf32>
    %207 = vector.extract_strided_slice %198 {offsets = [0, 128], sizes = [8, 128], strides = [1, 1]} : vector<8x512xf32> to vector<8x128xf32>
    %cst_95 = arith.constant 5.000000e-01 : f32
    %208 = vector.broadcast %cst_95 : f32 to vector<8x128xf32>
    %209 = arith.mulf %208, %207 : vector<8x128xf32>
    %210 = math.tanh %209 : vector<8x128xf32>
    %cst_96 = arith.constant 1.000000e+00 : f32
    %211 = vector.broadcast %cst_96 : f32 to vector<8x128xf32>
    %212 = arith.addf %210, %211 : vector<8x128xf32>
    %cst_97 = arith.constant 5.000000e-01 : f32
    %213 = vector.broadcast %cst_97 : f32 to vector<8x128xf32>
    %214 = arith.mulf %213, %212 : vector<8x128xf32>
    %215 = vector.extract_strided_slice %198 {offsets = [0, 256], sizes = [8, 128], strides = [1, 1]} : vector<8x512xf32> to vector<8x128xf32>
    %216 = math.tanh %215 : vector<8x128xf32>
    %217 = vector.extract_strided_slice %198 {offsets = [0, 384], sizes = [8, 128], strides = [1, 1]} : vector<8x512xf32> to vector<8x128xf32>
    %cst_98 = arith.constant 5.000000e-01 : f32
    %218 = vector.broadcast %cst_98 : f32 to vector<8x128xf32>
    %219 = arith.mulf %218, %217 : vector<8x128xf32>
    %220 = math.tanh %219 : vector<8x128xf32>
    %cst_99 = arith.constant 1.000000e+00 : f32
    %221 = vector.broadcast %cst_99 : f32 to vector<8x128xf32>
    %222 = arith.addf %220, %221 : vector<8x128xf32>
    %cst_100 = arith.constant 5.000000e-01 : f32
    %223 = vector.broadcast %cst_100 : f32 to vector<8x128xf32>
    %224 = arith.mulf %223, %222 : vector<8x128xf32>
    %225 = arith.mulf %214, %183 : vector<8x128xf32>
    %226 = arith.mulf %206, %216 : vector<8x128xf32>
    %227 = arith.addf %225, %226 : vector<8x128xf32>
    %228 = math.tanh %227 : vector<8x128xf32>
    %229 = arith.mulf %224, %228 : vector<8x128xf32>
    %230 = arith.truncf %229 : vector<8x128xf32> to vector<8x128xbf16>
    %c0_101 = arith.constant 0 : index
    %231 = arith.index_cast %c4_i32 : i32 to index
    %c0_102 = arith.constant 0 : index
    %c0_103 = arith.constant 0 : index
    %232 = vector.load %arg6[%c0_101, %231, %c0_102, %c0_103] : memref<1x8x8x128xbf16, #tpu.memory_space<vmem>>, vector<1x1x8x128xbf16>
    %233 = vector.shape_cast %232 : vector<1x1x8x128xbf16> to vector<8x128xbf16>
    %234 = vector.shape_cast %230 : vector<8x128xbf16> to vector<1x1x8x128xbf16>
    tpu.vector_store %arg6[%c0_101, %231, %c0_102, %c0_103], %234 {strides = array<i32>} : memref<1x8x8x128xbf16, #tpu.memory_space<vmem>>, vector<1x1x8x128xbf16>,
    %c5_i32 = arith.constant 5 : i32
    %235 = arith.index_cast %c5_i32 : i32 to index
    %c0_104 = arith.constant 0 : index
    %c0_105 = arith.constant 0 : index
    %236 = vector.load %arg7[%235, %c0_104, %c0_105] : memref<8x8x512xf32, #tpu.memory_space<vmem>>, vector<1x8x512xf32>
    %237 = vector.shape_cast %236 : vector<1x8x512xf32> to vector<8x512xf32>
    %238 = arith.truncf %229 : vector<8x128xf32> to vector<8x128xbf16>
    %c0_106 = arith.constant 0 : index
    %c0_107 = arith.constant 0 : index
    %c0_108 = arith.constant 0 : index
    %239 = vector.load %arg4[%c0_106, %c0_107, %c0_108] : memref<1x128x512xbf16, #tpu.memory_space<vmem>>, vector<1x128x512xbf16>
    %240 = vector.shape_cast %239 : vector<1x128x512xbf16> to vector<128x512xbf16>
    %cst_109 = arith.constant dense<0.000000e+00> : vector<8x512xf32>
    %241 = tpu.matmul %238, %240, %cst_109 {dimension_numbers = #tpu.dot_dimension_numbers<[1], [0], [0], [1], [0, 0, 1, 1], [], []>} : vector<8x128xbf16>, vector<128x512xbf16>, vector<8x512xf32> -> vector<8x512xf32>
    %242 = arith.addf %237, %241 : vector<8x512xf32>
    %243 = vector.extract_strided_slice %242 {offsets = [0, 0], sizes = [8, 128], strides = [1, 1]} : vector<8x512xf32> to vector<8x128xf32>
    %cst_110 = arith.constant 5.000000e-01 : f32
    %244 = vector.broadcast %cst_110 : f32 to vector<8x128xf32>
    %245 = arith.mulf %244, %243 : vector<8x128xf32>
    %246 = math.tanh %245 : vector<8x128xf32>
    %cst_111 = arith.constant 1.000000e+00 : f32
    %247 = vector.broadcast %cst_111 : f32 to vector<8x128xf32>
    %248 = arith.addf %246, %247 : vector<8x128xf32>
    %cst_112 = arith.constant 5.000000e-01 : f32
    %249 = vector.broadcast %cst_112 : f32 to vector<8x128xf32>
    %250 = arith.mulf %249, %248 : vector<8x128xf32>
    %251 = vector.extract_strided_slice %242 {offsets = [0, 128], sizes = [8, 128], strides = [1, 1]} : vector<8x512xf32> to vector<8x128xf32>
    %cst_113 = arith.constant 5.000000e-01 : f32
    %252 = vector.broadcast %cst_113 : f32 to vector<8x128xf32>
    %253 = arith.mulf %252, %251 : vector<8x128xf32>
    %254 = math.tanh %253 : vector<8x128xf32>
    %cst_114 = arith.constant 1.000000e+00 : f32
    %255 = vector.broadcast %cst_114 : f32 to vector<8x128xf32>
    %256 = arith.addf %254, %255 : vector<8x128xf32>
    %cst_115 = arith.constant 5.000000e-01 : f32
    %257 = vector.broadcast %cst_115 : f32 to vector<8x128xf32>
    %258 = arith.mulf %257, %256 : vector<8x128xf32>
    %259 = vector.extract_strided_slice %242 {offsets = [0, 256], sizes = [8, 128], strides = [1, 1]} : vector<8x512xf32> to vector<8x128xf32>
    %260 = math.tanh %259 : vector<8x128xf32>
    %261 = vector.extract_strided_slice %242 {offsets = [0, 384], sizes = [8, 128], strides = [1, 1]} : vector<8x512xf32> to vector<8x128xf32>
    %cst_116 = arith.constant 5.000000e-01 : f32
    %262 = vector.broadcast %cst_116 : f32 to vector<8x128xf32>
    %263 = arith.mulf %262, %261 : vector<8x128xf32>
    %264 = math.tanh %263 : vector<8x128xf32>
    %cst_117 = arith.constant 1.000000e+00 : f32
    %265 = vector.broadcast %cst_117 : f32 to vector<8x128xf32>
    %266 = arith.addf %264, %265 : vector<8x128xf32>
    %cst_118 = arith.constant 5.000000e-01 : f32
    %267 = vector.broadcast %cst_118 : f32 to vector<8x128xf32>
    %268 = arith.mulf %267, %266 : vector<8x128xf32>
    %269 = arith.mulf %258, %227 : vector<8x128xf32>
    %270 = arith.mulf %250, %260 : vector<8x128xf32>
    %271 = arith.addf %269, %270 : vector<8x128xf32>
    %272 = math.tanh %271 : vector<8x128xf32>
    %273 = arith.mulf %268, %272 : vector<8x128xf32>
    %274 = arith.truncf %273 : vector<8x128xf32> to vector<8x128xbf16>
    %c0_119 = arith.constant 0 : index
    %275 = arith.index_cast %c5_i32 : i32 to index
    %c0_120 = arith.constant 0 : index
    %c0_121 = arith.constant 0 : index
    %276 = vector.load %arg6[%c0_119, %275, %c0_120, %c0_121] : memref<1x8x8x128xbf16, #tpu.memory_space<vmem>>, vector<1x1x8x128xbf16>
    %277 = vector.shape_cast %276 : vector<1x1x8x128xbf16> to vector<8x128xbf16>
    %278 = vector.shape_cast %274 : vector<8x128xbf16> to vector<1x1x8x128xbf16>
    tpu.vector_store %arg6[%c0_119, %275, %c0_120, %c0_121], %278 {strides = array<i32>} : memref<1x8x8x128xbf16, #tpu.memory_space<vmem>>, vector<1x1x8x128xbf16>,
    %c6_i32 = arith.constant 6 : i32
    %279 = arith.index_cast %c6_i32 : i32 to index
    %c0_122 = arith.constant 0 : index
    %c0_123 = arith.constant 0 : index
    %280 = vector.load %arg7[%279, %c0_122, %c0_123] : memref<8x8x512xf32, #tpu.memory_space<vmem>>, vector<1x8x512xf32>
    %281 = vector.shape_cast %280 : vector<1x8x512xf32> to vector<8x512xf32>
    %282 = arith.truncf %273 : vector<8x128xf32> to vector<8x128xbf16>
    %c0_124 = arith.constant 0 : index
    %c0_125 = arith.constant 0 : index
    %c0_126 = arith.constant 0 : index
    %283 = vector.load %arg4[%c0_124, %c0_125, %c0_126] : memref<1x128x512xbf16, #tpu.memory_space<vmem>>, vector<1x128x512xbf16>
    %284 = vector.shape_cast %283 : vector<1x128x512xbf16> to vector<128x512xbf16>
    %cst_127 = arith.constant dense<0.000000e+00> : vector<8x512xf32>
    %285 = tpu.matmul %282, %284, %cst_127 {dimension_numbers = #tpu.dot_dimension_numbers<[1], [0], [0], [1], [0, 0, 1, 1], [], []>} : vector<8x128xbf16>, vector<128x512xbf16>, vector<8x512xf32> -> vector<8x512xf32>
    %286 = arith.addf %281, %285 : vector<8x512xf32>
    %287 = vector.extract_strided_slice %286 {offsets = [0, 0], sizes = [8, 128], strides = [1, 1]} : vector<8x512xf32> to vector<8x128xf32>
    %cst_128 = arith.constant 5.000000e-01 : f32
    %288 = vector.broadcast %cst_128 : f32 to vector<8x128xf32>
    %289 = arith.mulf %288, %287 : vector<8x128xf32>
    %290 = math.tanh %289 : vector<8x128xf32>
    %cst_129 = arith.constant 1.000000e+00 : f32
    %291 = vector.broadcast %cst_129 : f32 to vector<8x128xf32>
    %292 = arith.addf %290, %291 : vector<8x128xf32>
    %cst_130 = arith.constant 5.000000e-01 : f32
    %293 = vector.broadcast %cst_130 : f32 to vector<8x128xf32>
    %294 = arith.mulf %293, %292 : vector<8x128xf32>
    %295 = vector.extract_strided_slice %286 {offsets = [0, 128], sizes = [8, 128], strides = [1, 1]} : vector<8x512xf32> to vector<8x128xf32>
    %cst_131 = arith.constant 5.000000e-01 : f32
    %296 = vector.broadcast %cst_131 : f32 to vector<8x128xf32>
    %297 = arith.mulf %296, %295 : vector<8x128xf32>
    %298 = math.tanh %297 : vector<8x128xf32>
    %cst_132 = arith.constant 1.000000e+00 : f32
    %299 = vector.broadcast %cst_132 : f32 to vector<8x128xf32>
    %300 = arith.addf %298, %299 : vector<8x128xf32>
    %cst_133 = arith.constant 5.000000e-01 : f32
    %301 = vector.broadcast %cst_133 : f32 to vector<8x128xf32>
    %302 = arith.mulf %301, %300 : vector<8x128xf32>
    %303 = vector.extract_strided_slice %286 {offsets = [0, 256], sizes = [8, 128], strides = [1, 1]} : vector<8x512xf32> to vector<8x128xf32>
    %304 = math.tanh %303 : vector<8x128xf32>
    %305 = vector.extract_strided_slice %286 {offsets = [0, 384], sizes = [8, 128], strides = [1, 1]} : vector<8x512xf32> to vector<8x128xf32>
    %cst_134 = arith.constant 5.000000e-01 : f32
    %306 = vector.broadcast %cst_134 : f32 to vector<8x128xf32>
    %307 = arith.mulf %306, %305 : vector<8x128xf32>
    %308 = math.tanh %307 : vector<8x128xf32>
    %cst_135 = arith.constant 1.000000e+00 : f32
    %309 = vector.broadcast %cst_135 : f32 to vector<8x128xf32>
    %310 = arith.addf %308, %309 : vector<8x128xf32>
    %cst_136 = arith.constant 5.000000e-01 : f32
    %311 = vector.broadcast %cst_136 : f32 to vector<8x128xf32>
    %312 = arith.mulf %311, %310 : vector<8x128xf32>
    %313 = arith.mulf %302, %271 : vector<8x128xf32>
    %314 = arith.mulf %294, %304 : vector<8x128xf32>
    %315 = arith.addf %313, %314 : vector<8x128xf32>
    %316 = math.tanh %315 : vector<8x128xf32>
    %317 = arith.mulf %312, %316 : vector<8x128xf32>
    %318 = arith.truncf %317 : vector<8x128xf32> to vector<8x128xbf16>
    %c0_137 = arith.constant 0 : index
    %319 = arith.index_cast %c6_i32 : i32 to index
    %c0_138 = arith.constant 0 : index
    %c0_139 = arith.constant 0 : index
    %320 = vector.load %arg6[%c0_137, %319, %c0_138, %c0_139] : memref<1x8x8x128xbf16, #tpu.memory_space<vmem>>, vector<1x1x8x128xbf16>
    %321 = vector.shape_cast %320 : vector<1x1x8x128xbf16> to vector<8x128xbf16>
    %322 = vector.shape_cast %318 : vector<8x128xbf16> to vector<1x1x8x128xbf16>
    tpu.vector_store %arg6[%c0_137, %319, %c0_138, %c0_139], %322 {strides = array<i32>} : memref<1x8x8x128xbf16, #tpu.memory_space<vmem>>, vector<1x1x8x128xbf16>,
    %c7_i32 = arith.constant 7 : i32
    %323 = arith.index_cast %c7_i32 : i32 to index
    %c0_140 = arith.constant 0 : index
    %c0_141 = arith.constant 0 : index
    %324 = vector.load %arg7[%323, %c0_140, %c0_141] : memref<8x8x512xf32, #tpu.memory_space<vmem>>, vector<1x8x512xf32>
    %325 = vector.shape_cast %324 : vector<1x8x512xf32> to vector<8x512xf32>
    %326 = arith.truncf %317 : vector<8x128xf32> to vector<8x128xbf16>
    %c0_142 = arith.constant 0 : index
    %c0_143 = arith.constant 0 : index
    %c0_144 = arith.constant 0 : index
    %327 = vector.load %arg4[%c0_142, %c0_143, %c0_144] : memref<1x128x512xbf16, #tpu.memory_space<vmem>>, vector<1x128x512xbf16>
    %328 = vector.shape_cast %327 : vector<1x128x512xbf16> to vector<128x512xbf16>
    %cst_145 = arith.constant dense<0.000000e+00> : vector<8x512xf32>
    %329 = tpu.matmul %326, %328, %cst_145 {dimension_numbers = #tpu.dot_dimension_numbers<[1], [0], [0], [1], [0, 0, 1, 1], [], []>} : vector<8x128xbf16>, vector<128x512xbf16>, vector<8x512xf32> -> vector<8x512xf32>
    %330 = arith.addf %325, %329 : vector<8x512xf32>
    %331 = vector.extract_strided_slice %330 {offsets = [0, 0], sizes = [8, 128], strides = [1, 1]} : vector<8x512xf32> to vector<8x128xf32>
    %cst_146 = arith.constant 5.000000e-01 : f32
    %332 = vector.broadcast %cst_146 : f32 to vector<8x128xf32>
    %333 = arith.mulf %332, %331 : vector<8x128xf32>
    %334 = math.tanh %333 : vector<8x128xf32>
    %cst_147 = arith.constant 1.000000e+00 : f32
    %335 = vector.broadcast %cst_147 : f32 to vector<8x128xf32>
    %336 = arith.addf %334, %335 : vector<8x128xf32>
    %cst_148 = arith.constant 5.000000e-01 : f32
    %337 = vector.broadcast %cst_148 : f32 to vector<8x128xf32>
    %338 = arith.mulf %337, %336 : vector<8x128xf32>
    %339 = vector.extract_strided_slice %330 {offsets = [0, 128], sizes = [8, 128], strides = [1, 1]} : vector<8x512xf32> to vector<8x128xf32>
    %cst_149 = arith.constant 5.000000e-01 : f32
    %340 = vector.broadcast %cst_149 : f32 to vector<8x128xf32>
    %341 = arith.mulf %340, %339 : vector<8x128xf32>
    %342 = math.tanh %341 : vector<8x128xf32>
    %cst_150 = arith.constant 1.000000e+00 : f32
    %343 = vector.broadcast %cst_150 : f32 to vector<8x128xf32>
    %344 = arith.addf %342, %343 : vector<8x128xf32>
    %cst_151 = arith.constant 5.000000e-01 : f32
    %345 = vector.broadcast %cst_151 : f32 to vector<8x128xf32>
    %346 = arith.mulf %345, %344 : vector<8x128xf32>
    %347 = vector.extract_strided_slice %330 {offsets = [0, 256], sizes = [8, 128], strides = [1, 1]} : vector<8x512xf32> to vector<8x128xf32>
    %348 = math.tanh %347 : vector<8x128xf32>
    %349 = vector.extract_strided_slice %330 {offsets = [0, 384], sizes = [8, 128], strides = [1, 1]} : vector<8x512xf32> to vector<8x128xf32>
    %cst_152 = arith.constant 5.000000e-01 : f32
    %350 = vector.broadcast %cst_152 : f32 to vector<8x128xf32>
    %351 = arith.mulf %350, %349 : vector<8x128xf32>
    %352 = math.tanh %351 : vector<8x128xf32>
    %cst_153 = arith.constant 1.000000e+00 : f32
    %353 = vector.broadcast %cst_153 : f32 to vector<8x128xf32>
    %354 = arith.addf %352, %353 : vector<8x128xf32>
    %cst_154 = arith.constant 5.000000e-01 : f32
    %355 = vector.broadcast %cst_154 : f32 to vector<8x128xf32>
    %356 = arith.mulf %355, %354 : vector<8x128xf32>
    %357 = arith.mulf %346, %315 : vector<8x128xf32>
    %358 = arith.mulf %338, %348 : vector<8x128xf32>
    %359 = arith.addf %357, %358 : vector<8x128xf32>
    %360 = math.tanh %359 : vector<8x128xf32>
    %361 = arith.mulf %356, %360 : vector<8x128xf32>
    %362 = arith.truncf %361 : vector<8x128xf32> to vector<8x128xbf16>
    %c0_155 = arith.constant 0 : index
    %363 = arith.index_cast %c7_i32 : i32 to index
    %c0_156 = arith.constant 0 : index
    %c0_157 = arith.constant 0 : index
    %364 = vector.load %arg6[%c0_155, %363, %c0_156, %c0_157] : memref<1x8x8x128xbf16, #tpu.memory_space<vmem>>, vector<1x1x8x128xbf16>
    %365 = vector.shape_cast %364 : vector<1x1x8x128xbf16> to vector<8x128xbf16>
    %366 = vector.shape_cast %362 : vector<8x128xbf16> to vector<1x1x8x128xbf16>
    tpu.vector_store %arg6[%c0_155, %363, %c0_156, %c0_157], %366 {strides = array<i32>} : memref<1x8x8x128xbf16, #tpu.memory_space<vmem>>, vector<1x1x8x128xbf16>,
    %c8_i32 = arith.constant 8 : i32
    return
  }
  func.func @transform_0(%arg0: i32, %arg1: i32) -> (i32, i32, i32, i32) {
    %c0_i32 = arith.constant 0 : i32
    %c0_i32_0 = arith.constant 0 : i32
    %c0_i32_1 = arith.constant 0 : i32
    return %arg0, %c0_i32, %arg1, %c0_i32_0 : i32, i32, i32, i32
  }
  func.func @transform_1(%arg0: i32, %arg1: i32) -> (i32, i32, i32) {
    %c0_i32 = arith.constant 0 : i32
    %c0_i32_0 = arith.constant 0 : i32
    %c0_i32_1 = arith.constant 0 : i32
    return %arg0, %c0_i32, %c0_i32_0 : i32, i32, i32
  }
  func.func @transform_2(%arg0: i32, %arg1: i32) -> (i32, i32, i32) {
    %c0_i32 = arith.constant 0 : i32
    %c0_i32_0 = arith.constant 0 : i32
    %c0_i32_1 = arith.constant 0 : i32
    return %arg0, %c0_i32, %c0_i32_0 : i32, i32, i32
  }
  func.func @transform_3(%arg0: i32, %arg1: i32) -> (i32, i32, i32) {
    %c0_i32 = arith.constant 0 : i32
    %c0_i32_0 = arith.constant 0 : i32
    %c0_i32_1 = arith.constant 0 : i32
    return %arg0, %c0_i32, %c0_i32_0 : i32, i32, i32
  }
  func.func @transform_4(%arg0: i32, %arg1: i32) -> (i32, i32, i32, i32) {
    %c0_i32 = arith.constant 0 : i32
    %c0_i32_0 = arith.constant 0 : i32
    %c0_i32_1 = arith.constant 0 : i32
    return %arg0, %c0_i32, %arg1, %c0_i32_0 : i32, i32, i32, i32
  }
}

</mosaic_0001>

<bundles_post_ra>
// kernel: tpu_custom_call.1
= control target key start
LH: loop header
LB: loop body
LE: loop exit
PB: predicated region body
PF: predicated region fallthrough
CT: control target
= control target key end

     0   :  { %s4932_s0 = inlined_call_operand.hbm [shape: bf16[2,8,8,16], index: 0, kind: input, shape index: {}]   ;;  %s4933_s1 = inlined_call_operand.hbm [shape: bf16[2,16,512], index: 1, kind: input, shape index: {}]   ;;  %s4934_s2 = inlined_call_operand.hbm [shape: bf16[2,128,512], index: 2, kind: input, shape index: {}]   ;;  %s4935_s3 = inlined_call_operand.hbm [shape: f32[2,1,512], index: 3, kind: input, shape index: {}]   ;;  %s4936_s4 = inlined_call_operand.hbm [shape: bf16[2,8,8,128], index: 4, kind: output, shape index: {}]  }
   0x1   :  { %4945 = sst [smem:[#allocation38_spill]] %s4932_s0 }
   0x2   :  { %4946 = sst [smem:[#allocation39_spill]] %s4933_s1 }
   0x3   :  { %9 = vsyncpa [#allocation4], 0 }
   0x4   :  { %11 = vsyncpa [#allocation4 + $0x1], 0 }
   0x5   :  { %12 = vsyncpa [#allocation7], 0 }
   0x6   :  { %14 = vsyncpa [#allocation7 + $0x1], 0 }
   0x7   :  { %15 = vsyncpa [#allocation10], 0 }
   0x8   :  { %17 = vsyncpa [#allocation10 + $0x1], 0 }
   0x9   :  { %18 = vsyncpa [#allocation5], 0 }
   0xa   :  { %20 = vsyncpa [#allocation5 + $0x1], 0  ;;  %s4062_s15 = smov 0   ;;  %s4064_s16 = smov 0  }
   0xb   :  { %s4066_s17 = smov 0   ;;  %s4068_s18 = smov 0  }
   0xc   :  { %s4070_s19 = smov 0   ;;  %s4072_s20 = smov 0  }
   0xd LB: > { %4947 = sst [smem:[#allocation16_spill]] %s4011_s17  ;;  %s4093_s21 = sadd.s32 4294967295, %s4023_s20   ;;  %s4023_s20 = sphi %s4072_s20, %s26_s20   ;;  %s4019_s19 = sphi %s4070_s19, %s5005_s19   ;;  %s4015_s18 = sphi %s4068_s18, %s5004_s18   ;;  %s4011_s17 = sphi %s4066_s17, %s5000_s17   ;;  %s4007_s16 = sphi %s4064_s16, %s5003_s16   ;;  %s4003_s15 = sphi %s4062_s15, %s5002_s15  }
   0xe   : > { %4948 = sst [smem:[#allocation17_spill]] %s4023_s20  ;;  %s3243_s22 = sadd.s32 4294967294, %s4023_s20  }
   0xf   : > { %s38_s23 = sadd.s32 1, %s4019_s19  ;;  %s47_s24 = sadd.s32 1, %s4011_s17 }
  0x10   : > { %p40_p0 = scmp.ge.s32.totalorder %s38_s23, 2  ;;  %p54_p1 = scmp.ne.s32.totalorder %s4011_s17, %s4007_s16 }
  0x11   : > { %p55_p2 = scmp.eq.s32.totalorder %s4023_s20, 0  ;;  %p60_p3 = scmp.ne.s32.totalorder %s4007_s16, %s4003_s15 }
  0x12   : > { %s5007_s23 = smov (%p40_p0, %s38_s23), 0  ;;  %p61_p5 = scmp.eq.s32.totalorder %s4093_s21, 0 }
  0x13   : > { %4949 = sst [smem:[#allocation18_spill]] %s5007_s23  ;;  %p4105_p4 = por %p55_p2, %p54_p1 }
  0x14   : > { %s42_s26 = ssub.s32 %s4019_s19, %s5007_s23  ;;  %p164_p6 = scmp.eq.s32.totalorder %s4093_s21, 1 }
  0x15   : > { %p45_p7 = scmp.eq.s32.totalorder %s42_s26, 0  ;;  %p4113_p8 = por %p61_p5, %p60_p3 }
  0x16   : > { %p4117_p9 = por %p164_p6, %p54_p1  ;;  %p170_p10 = scmp.eq.s32.totalorder %s3243_s22, 1 }
  0x17   : > { %s4122_s29 = scalar_select %p45_p7, %s4011_s17, %s47_s24  }
  0x18   : > { %p4124_p11 = por %p170_p10, %p60_p3  ;;  %p3245_p12 = scmp.ge.s32.totalorder %s4023_s20, 2 }
  0x19   : > { %4953 = sst [smem:[#allocation19_spill]] %s4122_s29  ;;  %p3580_p13 = scmp.lt.s32.totalorder %s4023_s20, 2 }
  0x1a   : > { %s4131_s5 = sand.u32 1, %s4011_s17   ;;  %s3548_s7 = sshll.u32 %s4019_s19, 9 }
  0x1b   : > { %s3246_s6 = sshll.u32 %s4131_s5, 5  ;;  %p4137_p0 = pnand %p3580_p13, %p4105_p4 }
  0x1c   : > { %s212_s9 = sand.u32 1, %s4023_s20   ;;  %s4956_s1 = sld [smem:[#allocation39_spill]] }
  0x1d   : > { %s216_s13 = scalar_lea.vmem [#allocation6], %s3246_s6  ;;  %s4149_s22 = scalar_lea.sflag [#allocation7], %s212_s9 }
  0x1e   : > { %s223_s14 = sshll.u32 %s216_s13, 4  ;;  %p3825_p1 = pneg %p4137_p0  ;;  %s224_s14 = int_to_ptr.vmem [resolvable:$true] %s223_s14 }
  0x1f   : > { %s3836_s24 = scalar_lea.vmem %s224_s14, 512  ;;  %s4025_s25 = smov [#allocation6]  }
  0x20   : > { %p3837_p2 = scmp.ne.s32.totalorder %s224_s14, %s3836_s24  ;;  %s3841_s26 = sshll.u32 %s4025_s25, 4  ;;  %s3842_s26 = int_to_ptr.vmem [resolvable:$false] %s3841_s26 }
  0x21   : > { %s3843_s23 = scalar_lea.vmem %s3842_s26, 1024  ;;  %p3844_p5 = scmp.lt.s32.totalorder %s224_s14, %s3842_s26 }
  0x22   : > { %s222_s12 = scalar_lea.hbm %s4956_s1, %s3548_s7  ;;  %p3839_p3 = pnand %p3837_p2, %p3825_p1 }
  0x23   : > { %p3845_p6 = scmp.lt.s32.totalorder %s3843_s23, %s3836_s24 }
  0x24   : > { %p3840_p4 = pneg %p3839_p3 }
  0x25   : > { %p3846_p7 = por %p3845_p6, %p3844_p5 }
  0x27   : > { %p3847_p10 = pnand %p3846_p7, %p3840_p4 }
  0x29   : > { %3850 = shalt.err (!%p3847_p10)
}
  0x2a   : > { %s4938_s10 = smov 256   ;;  %s4939_s9 = smov 16  }
  0x2b   : > { %3569 = dma.hbm_to_vmem [thread:$0]  (!%p4137_p0), %s222_s12, 512, %s224_s14, %s4149_s22, %s4938_s10, %s4938_s10, %s4939_s9  }
  0x2c   : > { %p3258_p13 = scmp.ge.s32.totalorder %s4023_s20, 1  ;;  %p271_p2 = scmp.lt.s32.totalorder %s4023_s20, 3 }
  0x2d   : > { %s4958_s0 = sld [smem:[#allocation38_spill]]  ;;  %s194_s25 = scalar_lea.vmem [#allocation3], %s3246_s6 }
  0x2e   : > { %p4164_p3 = pnand %p3258_p13, %p271_p2  ;;  %s202_s26 = sshll.u32 %s194_s25, 4  ;;  %s203_s26 = int_to_ptr.vmem [resolvable:$true] %s202_s26 }
  0x2f   : > { %s191_s1 = scalar_lea.sflag [#allocation4], %s4131_s5  ;;  %s3864_s29 = scalar_lea.vmem %s203_s26, 512 }
  0x30   : > { %p3865_p4 = scmp.ne.s32.totalorder %s203_s26, %s3864_s29  ;;  %s4028_s12 = smov [#allocation3]  }
  0x31   : > { %s3869_s14 = sshll.u32 %s4028_s12, 4  ;;  %s3870_s14 = int_to_ptr.vmem [resolvable:$false] %s3869_s14 }
  0x32   : > { %p3867_p5 = pnand %p3865_p4, %p3825_p1  ;;  %s3871_s10 = scalar_lea.vmem %s3870_s14, 1024 }
  0x33   : > { %s201_s24 = scalar_lea.hbm %s4958_s0, %s3548_s7  ;;  %p3872_p7 = scmp.lt.s32.totalorder %s203_s26, %s3870_s14 }
  0x34   : > { %p3868_p6 = pneg %p3867_p5  ;;  %p3873_p10 = scmp.lt.s32.totalorder %s3871_s10, %s3864_s29 }
  0x36   : > { %p3874_p13 = por %p3873_p10, %p3872_p7 }
  0x38   : > { %p3875_p2 = pnand %p3874_p13, %p3868_p6 }
  0x3a   : > { %3878 = shalt.err (!%p3875_p2)
}
  0x3b   : > { %s4029_s7 = smov 64   ;;  %s4030_s6 = smov 4  }
  0x3c   : > { %3566 = dma.hbm_to_vmem [thread:$0]  (!%p4137_p0), %s201_s24, 512, %s203_s26, %s191_s1, %s4029_s7, %s4029_s7, %s4030_s6  }
  0x3d   : > { %s3252_s11 = sshll.u32 %s4131_s5, 8  ;;  %s3550_s13 = sshll.u32 %s4019_s19, 12 }
  0x3e   : > { %s243_s9 = scalar_lea.hbm %s4934_s2, %s3550_s13  ;;  %s237_s14 = scalar_lea.vmem [#allocation8], %s3252_s11 }
  0x3f   : > { %s244_s29 = sshll.u32 %s237_s14, 4  ;;  %s3255_s10 = sshll.u32 %s4131_s5, 2  ;;  %s245_s29 = int_to_ptr.vmem [resolvable:$true] %s244_s29 }
  0x40   : > { %s3892_s0 = scalar_lea.vmem %s245_s29, 4096  ;;  %s4031_s17 = smov [#allocation8]  }
  0x41   : > { %p3893_p4 = scmp.ne.s32.totalorder %s245_s29, %s3892_s0  ;;  %s3897_s20 = sshll.u32 %s4031_s17, 4  ;;  %s3898_s20 = int_to_ptr.vmem [resolvable:$false] %s3897_s20 }
  0x42   : > { %s3899_s1 = scalar_lea.vmem %s3898_s20, 8192  ;;  %p3900_p7 = scmp.lt.s32.totalorder %s245_s29, %s3898_s20 }
  0x43   : > { %p3895_p5 = pnand %p3893_p4, %p3825_p1  ;;  %p3901_p10 = scmp.lt.s32.totalorder %s3899_s1, %s3892_s0 }
  0x45   : > { %p3896_p6 = pneg %p3895_p5  ;;  %p3902_p13 = por %p3901_p10, %p3900_p7 }
  0x47   : > { %p3903_p2 = pnand %p3902_p13, %p3896_p6 }
  0x49   : > { %3906 = shalt.err (!%p3903_p2)
}
  0x4a   : > { %s4959_s24 = smov 16   ;;  %s4960_s26 = smov 256  }
  0x4b   : > { %3572 = dma.hbm_to_vmem [thread:$0]  (!%p4137_p0), %s243_s9, 4096, %s245_s29, %s4149_s22, %s4960_s26, %s4960_s26, %s4959_s24  }
  0x4c   : > { %s3551_s7 = sshll.u32 %s4019_s19, 6  ;;  %s258_s20 = scalar_lea.vmem [#allocation9], %s3255_s10 }
  0x4d   : > { %s264_s11 = scalar_lea.hbm %s4935_s3, %s3551_s7  ;;  %s266_s0 = sshll.u32 %s258_s20, 4  ;;  %s267_s0 = int_to_ptr.vmem [resolvable:$true] %s266_s0 }
  0x4e   : > { %s255_s13 = scalar_lea.sflag [#allocation10], %s4131_s5  ;;  %s3920_s25 = scalar_lea.vmem %s267_s0, 64 }
  0x4f   : > { %p3921_p4 = scmp.ne.s32.totalorder %s267_s0, %s3920_s25  ;;  %s4032_s12 = smov [#allocation9]  }
  0x50   : > { %s3925_s14 = sshll.u32 %s4032_s12, 4  ;;  %s3926_s14 = int_to_ptr.vmem [resolvable:$false] %s3925_s14 }
  0x51   : > { %p3923_p5 = pnand %p3921_p4, %p3825_p1  ;;  %s3927_s1 = scalar_lea.vmem %s3926_s14, 128 }
  0x52   : > { %p3928_p7 = scmp.lt.s32.totalorder %s267_s0, %s3926_s14  ;;  %p3929_p10 = scmp.lt.s32.totalorder %s3927_s1, %s3920_s25 }
  0x53   : > { %p3924_p6 = pneg %p3923_p5 }
  0x54   : > { %p3930_p13 = por %p3929_p10, %p3928_p7 }
  0x56   : > { %p3931_p2 = pnand %p3930_p13, %p3924_p6 }
  0x58   : > { %3934 = shalt.err (!%p3931_p2)
}
  0x59   : > { %3575 = dma.hbm_to_vmem [thread:$0]  (!%p4137_p0), %s264_s11, 64, %s267_s0, %s255_s13  }
  0x5a   : > { %275 = sbr.rel (%p4164_p3) target bundleno = 2070 (0x816), region = 36 }
  0x5f   : > { %s4209_s5 = sand.u32 1, %s4007_s16  }
  0x60   : > { %s4212_s22 = sshll.u32 %s4209_s5, 5  ;;  %s278_s9 = scalar_lea.sflag [#allocation4], %s4209_s5 }
  0x61   : > { %s4216_s29 = scalar_lea.vmem [#allocation3], %s4212_s22 }
  0x62   : > { %3986 = dma.done.wait (%p4113_p8), %s278_s9, 512  }
  0x63   : > { %3988 = vsyncadd (%p4113_p8), %s278_s9, 4294966784  ;;  %s286_s8 = sand.u32 1, %s4093_s21   ;;  %s290_s10 = scalar_lea.vmem [#allocation6], %s4212_s22 }
  0x64   : > { %s287_s23 = scalar_lea.sflag [#allocation7], %s286_s8 }
  0x65   : > { %3990 = dma.done.wait (%p4113_p8), %s287_s23, 4608  }
  0x66   : > { %3992 = vsyncadd (%p4113_p8), %s287_s23, 4294962688  ;;  %s3261_s24 = sshll.u32 %s4209_s5, 8  ;;  %s3262_s26 = sshll.u32 %s4209_s5, 2 }
  0x67   : > { %s4230_s7 = scalar_lea.vmem [#allocation8], %s3261_s24  ;;  %s305_s6 = scalar_lea.sflag [#allocation10], %s4209_s5 }
  0x68   : > { %s4233_s17 = scalar_lea.vmem [#allocation9], %s3262_s26 }
  0x69   : > { %3994 = dma.done.wait (%p4113_p8), %s305_s6, 64  }
  0x6a   : > { %3996 = vsyncadd (%p4113_p8), %s305_s6, 4294967232  ;;  %v4943_v0 = vmov 0   ;;  %v3637_v1 = vld [vmem:[%s290_s10 + $0x4] ss:$16 sps:$4 sm:$0xff]   ;;  %v3639_v2 = vld [vmem:[%s290_s10 + $0xc] ss:$16 sps:$4 sm:$0xff]   ;;  %v562_v41 = vlaneseq }
  0x6b   : > { %446 = vmatprep.mubr.bf16.mxu0 %v4943_v0  ;;  %519 = vmatprep.mubr.bf16.mxu1 %v4943_v0  ;;  %v3641_v3 = vld [vmem:[%s290_s10] ss:$16 sps:$4 sm:$0xff]   ;;  %v3642_v4 = vld [vmem:[%s290_s10 + $0x8] ss:$16 sps:$4 sm:$0xff]   ;;  %vm401_vm0 = vcmask 130048   ;;  %s4520_s21 = scalar_lea.vmem [#allocation11], %s4212_s22 }
  0x6c   : > { %428 = vmatprep.subr.bf16.mxu0 %v3637_v1  ;;  %501 = vmatprep.subr.bf16.mxu1 %v3639_v2  ;;  %v3643_v5 = vld [vmem:[%s4216_s29] sm:$0xff]   ;;  %v4249_v8 = vld [vmem:[%s4230_s7 + $0xe8] ss:$16 sps:$4 sm:$0xff]   ;;  %v4253_v9 = vld [vmem:[%s4230_s7 + $0xec] ss:$16 sps:$4 sm:$0xff]   ;;  %v563_v42 = vshrl.u32 %v562_v41, 7 }
  0x6d   : > { %429 = vmatpush1.bf16.msra.mxu0 %v3641_v3  ;;  %502 = vmatpush1.bf16.msra.mxu1 %v3642_v4  ;;  %v4243_v6 = vld [vmem:[%s4230_s7 + $0xe0] ss:$16 sps:$4 sm:$0xff]   ;;  %v4246_v7 = vld [vmem:[%s4230_s7 + $0xe4] ss:$16 sps:$4 sm:$0xff]   ;;  %v4266_v12 = vld [vmem:[%s4230_s7 + $0xcc] ss:$16 sps:$4 sm:$0xff]  }
  0x6e   : > { %842 = vmatprep.subr.bf16.mxu0 %v4246_v7  ;;  %v4258_v10 = vld [vmem:[%s4230_s7 + $0xc4] ss:$16 sps:$4 sm:$0xff]   ;;  %883 = vmatprep.subr.bf16.mxu1 %v4253_v9  ;;  %v4263_v11 = vld [vmem:[%s4230_s7 + $0xc0] ss:$16 sps:$4 sm:$0xff]   ;;  %v4271_v13 = vld [vmem:[%s4230_s7 + $0xc8] ss:$16 sps:$4 sm:$0xff]  }
  0x6f   : > { %v3656_v14 = vld [vmem:[%s4216_s29 + $0x8] sm:$0xff]   ;;  %v4278_v15 = vld [vmem:[%s4230_s7 + $0xa4] ss:$16 sps:$4 sm:$0xff]   ;;  %v4282_v16 = vld [vmem:[%s4230_s7 + $0xa0] ss:$16 sps:$4 sm:$0xff]   ;;  %v572_v43 = vsub.s32 2, %v563_v42 }
  0x70   : > { %3272 = vmatmul.mubr.msk.bf16.vlgmr.msra.gmra.mxu0 %vm401_vm0, %v3643_v5  ;;  %3276 = vmatmul.mubr.msk.bf16.vlgmr.msra.gmra.mxu1 %vm401_vm0, %v3643_v5  ;;  %v4285_v17 = vld [vmem:[%s4230_s7 + $0xac] ss:$16 sps:$4 sm:$0xff]   ;;  %v4290_v18 = vld [vmem:[%s4230_s7 + $0xa8] ss:$16 sps:$4 sm:$0xff]   ;;  %v4293_v19 = vld [vmem:[%s4230_s7 + $0x84] ss:$16 sps:$4 sm:$0xff]  }
  0x71   : > { %843 = vmatpush1.bf16.msra.mxu0 %v4243_v6  ;;  %884 = vmatpush1.bf16.msra.mxu1 %v4249_v8  ;;  %v4299_v20 = vld [vmem:[%s4230_s7 + $0x8c] ss:$16 sps:$4 sm:$0xff]   ;;  %v4303_v21 = vld [vmem:[%s4230_s7 + $0x80] ss:$16 sps:$4 sm:$0xff]   ;;  %v4309_v22 = vld [vmem:[%s4230_s7 + $0x88] ss:$16 sps:$4 sm:$0xff]  }
  0x72   : > { %844 = vmatprep.subr.bf16.mxu0 %v4258_v10  ;;  %885 = vmatprep.subr.bf16.mxu1 %v4266_v12  ;;  %v4312_v23 = vld [vmem:[%s4230_s7 + $0x64] ss:$16 sps:$4 sm:$0xff]   ;;  %v4317_v24 = vld [vmem:[%s4230_s7 + $0x6c] ss:$16 sps:$4 sm:$0xff]   ;;  %v4322_v26 = vld [vmem:[%s4230_s7 + $0x60] ss:$16 sps:$4 sm:$0xff]  }
  0x73   : > { %456 = vmatprep.mubr.bf16.mxu0 %v4943_v0  ;;  %529 = vmatprep.mubr.bf16.mxu1 %v4943_v0  ;;  %v3669_v25 = vld [vmem:[%s4216_s29 + $0x10] sm:$0xff]   ;;  %v4327_v27 = vld [vmem:[%s4230_s7 + $0x68] ss:$16 sps:$4 sm:$0xff]   ;;  %v4334_v29 = vld [vmem:[%s4230_s7 + $0x4c] ss:$16 sps:$4 sm:$0xff]   ;;  %v564_v44 = vsub.s32 0, %v563_v42 }
  0x74   : > { %v4330_v28 = vld [vmem:[%s4230_s7 + $0x44] ss:$16 sps:$4 sm:$0xff]   ;;  %v4339_v30 = vld [vmem:[%s4230_s7 + $0x40] ss:$16 sps:$4 sm:$0xff]   ;;  %v4343_v31 = vld [vmem:[%s4230_s7 + $0x48] ss:$16 sps:$4 sm:$0xff]  }
  0x75   : > { %845 = vmatpush1.bf16.msra.mxu0 %v4263_v11  ;;  %886 = vmatpush1.bf16.msra.mxu1 %v4271_v13  ;;  %v3682_v32 = vld [vmem:[%s4216_s29 + $0x18] sm:$0xff]   ;;  %v4350_v33 = vld [vmem:[%s4230_s7 + $0x24] ss:$16 sps:$4 sm:$0xff]   ;;  %v4355_v34 = vld [vmem:[%s4230_s7 + $0x20] ss:$16 sps:$4 sm:$0xff]   ;;  %v576_v45 = vsub.s32 3, %v563_v42 }
  0x76   : > { %846 = vmatprep.subr.bf16.mxu0 %v4278_v15  ;;  %887 = vmatprep.subr.bf16.mxu1 %v4285_v17  ;;  %v4358_v35 = vld [vmem:[%s4230_s7 + $0x2c] ss:$16 sps:$4 sm:$0xff]   ;;  %v4361_v36 = vld [vmem:[%s4230_s7 + $0x28] ss:$16 sps:$4 sm:$0xff]   ;;  %v4364_v37 = vld [vmem:[%s4230_s7 + $0x4] ss:$16 sps:$4 sm:$0xff]  }
  0x77   : > { %v4368_v38 = vld [vmem:[%s4230_s7 + $0xc] ss:$16 sps:$4 sm:$0xff]   ;;  %v4374_v39 = vld [vmem:[%s4230_s7] ss:$16 sps:$4 sm:$0xff]   ;;  %v4379_v40 = vld [vmem:[%s4230_s7 + $0x8] ss:$16 sps:$4 sm:$0xff]  }
  0x78   : > { %3273 = vmatmul.mubr.msk.bf16.gmra.mxu0 %vm401_vm0, %v3656_v14  ;;  %3277 = vmatmul.mubr.msk.bf16.gmra.mxu1 %vm401_vm0, %v3656_v14  ;;  %v560_v47 = vld [vmem:[%s4233_s17] sm:$0xf]  ;;  %v568_v50 = vsub.s32 1, %v563_v42  ;;  %s3552_s27 = sshll.u32 %s4015_s18, 9  ;;  %s3091_s11 = sshll.u32 %s4520_s21, 4  ;;  %s4883_s11 = int_to_ptr.vmem [resolvable:$true] %s3091_s11 }
  0x79   : > { %847 = vmatpush1.bf16.msra.mxu0 %v4282_v16  ;;  %466 = vmatprep.mubr.bf16.mxu0 %v4943_v0  ;;  %v4432_v49 = vrot.slane %v560_v47, %v572_v43  ;;  %v565_v53 = vrot.slane %v560_v47, %v564_v44  ;;  %v4438_v54 = vrot.slane %v560_v47, %v576_v45  ;;  %s4881_s13 = scalar_lea.hbm %s4936_s4, %s3552_s27  ;;  %s3077_s25 = scalar_lea.sflag [#allocation5], %s4209_s5 }
  0x7a   : > { %888 = vmatpush1.bf16.msra.mxu1 %v4290_v18  ;;  %848 = vmatprep.subr.bf16.mxu0 %v4293_v19  ;;  %v569_v57 = vrot.slane %v560_v47, %v568_v50  ;;  %s3935_s12 = scalar_lea.vmem %s4883_s11, 512  ;;  %s4034_s18 = smov [#allocation11]  }
  0x7b   : > { %889 = vmatprep.subr.bf16.mxu1 %v4299_v20  ;;  %539 = vmatprep.mubr.bf16.mxu1 %v4943_v0  ;;  %p3936_p8 = scmp.ne.s32.totalorder %s4883_s11, %s3935_s12  ;;  %s3939_s14 = sshll.u32 %s4034_s18, 4  ;;  %s3940_s14 = int_to_ptr.vmem [resolvable:$false] %s3939_s14 }
  0x7c   : > { %s3941_s1 = scalar_lea.vmem %s3940_s14, 1024  ;;  %p3942_p3 = scmp.lt.s32.totalorder %s4883_s11, %s3940_s14 }
  0x7d   : > { %849 = vmatpush1.bf16.msra.mxu0 %v4303_v21  ;;  %p3937_p0 = pnand %p3936_p8, %p4117_p9  ;;  %p3943_p4 = scmp.lt.s32.totalorder %s3941_s1, %s3935_s12 }
  0x7e   : > { %890 = vmatpush1.bf16.msra.mxu1 %v4309_v22  ;;  %850 = vmatprep.subr.bf16.mxu0 %v4312_v23 }
  0x7f   : > { %891 = vmatprep.subr.bf16.mxu1 %v4317_v24  ;;  %p3938_p1 = pneg %p3937_p0  ;;  %p3944_p5 = por %p3943_p4, %p3942_p3 }
  0x80   : > { %3274 = vmatmul.mubr.msk.bf16.gmra.mxu0 %vm401_vm0, %v3669_v25  ;;  %3278 = vmatmul.mubr.msk.bf16.gmra.mxu1 %vm401_vm0, %v3669_v25 }
  0x81   : > { %851 = vmatpush1.bf16.msra.mxu0 %v4322_v26  ;;  %476 = vmatprep.mubr.bf16.mxu0 %v4943_v0  ;;  %p3945_p6 = pnand %p3944_p5, %p3938_p1 }
  0x82   : > { %892 = vmatpush1.bf16.msra.mxu1 %v4327_v27  ;;  %852 = vmatprep.subr.bf16.mxu0 %v4330_v28 }
  0x83   : > { %893 = vmatprep.subr.bf16.mxu1 %v4334_v29  ;;  %549 = vmatprep.mubr.bf16.mxu1 %v4943_v0 }
  0x85   : > { %853 = vmatpush1.bf16.msra.mxu0 %v4339_v30 }
  0x86   : > { %894 = vmatpush1.bf16.msra.mxu1 %v4343_v31  ;;  %854 = vmatprep.subr.bf16.mxu0 %v4350_v33 }
  0x87   : > { %895 = vmatprep.subr.bf16.mxu1 %v4358_v35 }
  0x88   : > { %3275 = vmatmul.mubr.msk.bf16.gmra.mxu0 %vm401_vm0, %v3682_v32  ;;  %3279 = vmatmul.mubr.msk.bf16.gmra.mxu1 %vm401_vm0, %v3682_v32 }
  0x89   : > { %855 = vmatpush1.bf16.msra.mxu0 %v4355_v34  ;;  %874 = vmatprep.mubr.bf16.mxu0 %v4943_v0 }
  0x8a   : > { %896 = vmatpush1.bf16.msra.mxu1 %v4361_v36  ;;  %856 = vmatprep.subr.bf16.mxu0 %v4364_v37 }
  0x8b   : > { %897 = vmatprep.subr.bf16.mxu1 %v4368_v38  ;;  %915 = vmatprep.mubr.bf16.mxu1 %v4943_v0 }
  0x8d   : > { %857 = vmatpush1.bf16.msra.mxu0 %v4374_v39 }
  0x8e   : > { %898 = vmatpush1.bf16.msra.mxu1 %v4379_v40  ;;  %1145 = vmatprep.subr.bf16.mxu0 %v4246_v7 }
  0x8f   : > { %1186 = vmatprep.subr.bf16.mxu1 %v4253_v9 }
  0x90   : > { %875 = vmatmul.mubr.bf16.vlgmr.msra.gmra.mxu0 %v4943_v0 }
  0x91   : > { %916 = vmatmul.mubr.bf16.vlgmr.msra.gmra.mxu1 %v4943_v0  ;;  %1146 = vmatpush1.bf16.msra.mxu0 %v4243_v6 }
  0x92   : > { %1187 = vmatpush1.bf16.msra.mxu1 %v4249_v8  ;;  %1147 = vmatprep.subr.bf16.mxu0 %v4258_v10 }
  0x93   : > { %1188 = vmatprep.subr.bf16.mxu1 %v4266_v12  ;;  %1177 = vmatprep.mubr.bf16.mxu0 %v4943_v0 }
  0x94   : > { %1218 = vmatprep.mubr.bf16.mxu1 %v4943_v0 }
  0x95   : > { %1148 = vmatpush1.bf16.msra.mxu0 %v4263_v11 }
  0x96   : > { %1189 = vmatpush1.bf16.msra.mxu1 %v4271_v13  ;;  %1149 = vmatprep.subr.bf16.mxu0 %v4278_v15 }
  0x97   : > { %1190 = vmatprep.subr.bf16.mxu1 %v4285_v17 }
  0x99   : > { %1150 = vmatpush1.bf16.msra.mxu0 %v4282_v16 }
  0x9a   : > { %1191 = vmatpush1.bf16.msra.mxu1 %v4290_v18  ;;  %1151 = vmatprep.subr.bf16.mxu0 %v4293_v19 }
  0x9b   : > { %1192 = vmatprep.subr.bf16.mxu1 %v4299_v20 }
  0x9d   : > { %1152 = vmatpush1.bf16.msra.mxu0 %v4303_v21 }
  0x9e   : > { %1193 = vmatpush1.bf16.msra.mxu1 %v4309_v22  ;;  %1153 = vmatprep.subr.bf16.mxu0 %v4312_v23 }
  0x9f   : > { %1194 = vmatprep.subr.bf16.mxu1 %v4317_v24 }
  0xa1   : > { %1154 = vmatpush1.bf16.msra.mxu0 %v4322_v26 }
  0xa2   : > { %1195 = vmatpush1.bf16.msra.mxu1 %v4327_v27  ;;  %1155 = vmatprep.subr.bf16.mxu0 %v4330_v28 }
  0xa3   : > { %1196 = vmatprep.subr.bf16.mxu1 %v4334_v29 }
  0xa5   : > { %1156 = vmatpush1.bf16.msra.mxu0 %v4339_v30 }
  0xa6   : > { %1197 = vmatpush1.bf16.msra.mxu1 %v4343_v31  ;;  %1157 = vmatprep.subr.bf16.mxu0 %v4350_v33 }
  0xa7   : > { %1198 = vmatprep.subr.bf16.mxu1 %v4358_v35 }
  0xa9   : > { %1158 = vmatpush1.bf16.msra.mxu0 %v4355_v34 }
  0xaa   : > { %1199 = vmatpush1.bf16.msra.mxu1 %v4361_v36  ;;  %1159 = vmatprep.subr.bf16.mxu0 %v4364_v37 }
  0xab   : > { %1200 = vmatprep.subr.bf16.mxu1 %v4368_v38 }
  0xad   : > { %1160 = vmatpush1.bf16.msra.mxu0 %v4374_v39 }
  0xae   : > { %1201 = vmatpush1.bf16.msra.mxu1 %v4379_v40  ;;  %1449 = vmatprep.subr.bf16.mxu0 %v4246_v7 }
  0xaf   : > { %1490 = vmatprep.subr.bf16.mxu1 %v4253_v9 }
 0x130   : > { %v4427_v46 = vpop.f32.mrf.mxu0  ;;  %v4430_v48 = vpop.f32.mrf.mxu1 }
 0x132   : > { %v4434_v51 = vpop.f32.mrf.mxu0  ;;  %v4436_v52 = vpop.f32.mrf.mxu1 }
 0x134   : > { %v452_v55 = vpop.f32.mrf.mxu0  ;;  %v525_v56 = vpop.f32.mrf.mxu1 }
 0x135   : > { %v4440_v58 = vadd.f32 %v565_v53, %v452_v55  ;;  %v4443_v59 = vadd.f32 %v4432_v49, %v525_v56 }
 0x136   : > { %v454_v60 = vpop.f32.mrf.mxu0  ;;  %v527_v61 = vpop.f32.mrf.mxu1 }
 0x137   : > { %v4445_v62 = vadd.f32 %v569_v57, %v454_v60  ;;  %v4448_v63 = vadd.f32 %v4438_v54, %v527_v61 }
 0x138   : > { %v458_v1 = vpop.f32.mrf.mxu0  ;;  %v531_v2 = vpop.f32.mrf.mxu1 }
 0x139   : > { %v4450_v3 = vadd.f32 %v565_v53, %v458_v1  ;;  %v4453_v4 = vadd.f32 %v4432_v49, %v531_v2 }
 0x13a   : > { %v460_v5 = vpop.f32.mrf.mxu0  ;;  %v533_v14 = vpop.f32.mrf.mxu1 }
 0x13b   : > { %v4455_v25 = vadd.f32 %v569_v57, %v460_v5  ;;  %v4458_v32 = vadd.f32 %v4438_v54, %v533_v14 }
 0x13c   : > { %v462_v41 = vpop.f32.mrf.mxu0  ;;  %v535_v42 = vpop.f32.mrf.mxu1 }
 0x13d   : > { %v4460_v43 = vadd.f32 %v565_v53, %v462_v41  ;;  %v4463_v44 = vadd.f32 %v4432_v49, %v535_v42 }
 0x13e   : > { %v464_v45 = vpop.f32.mrf.mxu0  ;;  %v537_v47 = vpop.f32.mrf.mxu1 }
 0x13f   : > { %4961 = vst [vmem:[#allocation20_spill] sm:$0xff] %v4463_v44  ;;  %v4465_v50 = vadd.f32 %v569_v57, %v464_v45  ;;  %v4468_v55 = vadd.f32 %v4438_v54, %v537_v47 }
 0x140   : > { %v468_v56 = vpop.f32.mrf.mxu0  ;;  %v541_v60 = vpop.f32.mrf.mxu1 }
 0x141   : > { %4962 = vst [vmem:[#allocation21_spill] sm:$0xff] %v4465_v50  ;;  %4963 = vst [vmem:[#allocation22_spill] sm:$0xff] %v4468_v55  ;;  %v4470_v61 = vadd.f32 %v565_v53, %v468_v56  ;;  %v4473_v1 = vadd.f32 %v4432_v49, %v541_v60 }
 0x142   : > { %v470_v2 = vpop.f32.mrf.mxu0  ;;  %v543_v5 = vpop.f32.mrf.mxu1 }
 0x143   : > { %4964 = vst [vmem:[#allocation23_spill] sm:$0xff] %v4470_v61  ;;  %4965 = vst [vmem:[#allocation24_spill] sm:$0xff] %v4473_v1  ;;  %v4475_v14 = vadd.f32 %v569_v57, %v470_v2  ;;  %v4478_v41 = vadd.f32 %v4438_v54, %v543_v5 }
 0x144   : > { %v472_v42 = vpop.f32.mrf.mxu0  ;;  %v545_v45 = vpop.f32.mrf.mxu1 }
 0x145   : > { %4966 = vst [vmem:[#allocation25_spill] sm:$0xff] %v4475_v14  ;;  %4967 = vst [vmem:[#allocation26_spill] sm:$0xff] %v4478_v41  ;;  %v4480_v0 = vadd.f32 %v565_v53, %v472_v42  ;;  %v4483_v47 = vadd.f32 %v4432_v49, %v545_v45 }
 0x146   : > { %v474_v55 = vpop.f32.mrf.mxu0  ;;  %v547_v56 = vpop.f32.mrf.mxu1 }
 0x147   : > { %4968 = vst [vmem:[#allocation27_spill] sm:$0xff] %v4480_v0  ;;  %4969 = vst [vmem:[#allocation28_spill] sm:$0xff] %v4483_v47  ;;  %v4485_v61 = vadd.f32 %v569_v57, %v474_v55  ;;  %v4488_v60 = vadd.f32 %v4438_v54, %v547_v56 }
 0x148   : > { %v478_v1 = vpop.f32.mrf.mxu0  ;;  %v551_v2 = vpop.f32.mrf.mxu1 }
 0x149   : > { %4970 = vst [vmem:[#allocation29_spill] sm:$0xff] %v4485_v61  ;;  %4971 = vst [vmem:[#allocation30_spill] sm:$0xff] %v4488_v60  ;;  %v4490_v14 = vadd.f32 %v565_v53, %v478_v1  ;;  %v4493_v5 = vadd.f32 %v4432_v49, %v551_v2 }
 0x14a   : > { %v480_v41 = vpop.f32.mrf.mxu0  ;;  %v553_v42 = vpop.f32.mrf.mxu1 }
 0x14b   : > { %4972 = vst [vmem:[#allocation31_spill] sm:$0xff] %v4490_v14  ;;  %4973 = vst [vmem:[#allocation32_spill] sm:$0xff] %v4493_v5  ;;  %v4495_v0 = vadd.f32 %v569_v57, %v480_v41  ;;  %v4498_v45 = vadd.f32 %v4438_v54, %v553_v42  ;;  %v582_v14 = vadd.f32 %v565_v53, %v4427_v46 }
 0x14c   : > { %v482_v47 = vpop.f32.mrf.mxu0  ;;  %v555_v55 = vpop.f32.mrf.mxu1  ;;  %v583_v42 = vadd.f32 %v569_v57, %v4434_v51  ;;  %v585_v51 = vadd.f32 %v4438_v54, %v4436_v52 }
 0x14d   : > { %4974 = vst [vmem:[#allocation33_spill] sm:$0xff] %v4495_v0  ;;  %4975 = vst [vmem:[#allocation34_spill] sm:$0xff] %v4498_v45  ;;  %v4500_v61 = vadd.f32 %v565_v53, %v482_v47  ;;  %v4503_v56 = vadd.f32 %v4432_v49, %v555_v55 }
 0x14e   : > { %v484_v60 = vpop.f32.mrf.mxu0  ;;  %v557_v1 = vpop.f32.mrf.mxu1 }
 0x14f   : > { %4976 = vst [vmem:[#allocation35_spill] sm:$0xff] %v4500_v61  ;;  %4977 = vst [vmem:[#allocation36_spill] sm:$0xff] %v4503_v56  ;;  %v4506_v2 = vadd.f32 %v569_v57, %v484_v60  ;;  %v4509_v5 = vadd.f32 %v4438_v54, %v557_v1  ;;  %v584_v56 = vadd.f32 %v4432_v49, %v4430_v48 }
 0x150   : > { %v876_v41 = vpop.f32.mrf.mxu0 }
 0x151   : > { %4978 = vst [vmem:[#allocation37_spill] sm:$0xff] %v4506_v2  ;;  %v924_v45 = vadd.f32 %v876_v41, %v582_v14  ;;  %v917_v0 = vpop.f32.mrf.mxu1 }
 0x152   : > { %v878_v44 = vpop.f32.mrf.mxu0  ;;  %v926_v2 = vadd.f32 %v917_v0, %v584_v56 }
 0x153   : > { %v928_v47 = vmul.f32 0.5, %v924_v45  ;;  %v925_v61 = vadd.f32 %v878_v44, %v583_v42  ;;  %v919_v50 = vpop.f32.mrf.mxu1 }
 0x154   : > { %v880_v55 = vpop.f32.mrf.mxu0  ;;  %v927_v57 = vadd.f32 %v919_v50, %v585_v51 }
 0x155   : > { %3743 = vtanh.f32 %v928_v47  ;;  %v932_v46 = vmul.f32 0.5, %v925_v61  ;;  %v921_v53 = vpop.f32.mrf.mxu1 }
 0x156   : > { %v881_v60 = vpop.f32.mrf.mxu0  ;;  %v937_v14 = vmul.f32 0.5, %v927_v57  ;;  %v4979_v53 = vmov 0  }
 0x157   : > { %3745 = vtanh.f32 %v932_v46  ;;  %v922_v1 = vpop.f32.mrf.mxu1 }
 0x158   : > { %3747 = vtanh.f32 %v926_v2 }
 0x159   : > { %3749 = vtanh.f32 %v937_v14 }
 0x162   : > { %v3744_v45 = vpop.eup %3743 }
 0x163   : > { %v930_v44 = vadd.f32 1.0, %v3744_v45 }
 0x164   : > { %v3746_v41 = vpop.eup %3745 }
 0x165   : > { %v931_v42 = vmul.f32 0.5, %v930_v44  ;;  %v934_v55 = vadd.f32 1.0, %v3746_v41  ;;  %v3748_v49 = vpop.eup %3747 }
 0x166   : > { %v3750_v56 = vpop.eup %3749 }
 0x167   : > { %v935_v48 = vmul.f32 0.5, %v934_v55  ;;  %v942_v47 = vmul.f32 %v3748_v49, %v931_v42  ;;  %v939_v52 = vadd.f32 1.0, %v3750_v56 }
 0x169   : > { %v941_v61 = vmul.f32 0.0, %v935_v48  ;;  %v940_v54 = vmul.f32 0.5, %v939_v52 }
 0x16b   : > { %v4516_v0 = vadd.f32 %v942_v47, %v941_v61 }
 0x16d   : > { %3751 = vtanh.f32 %v4516_v0 }
 0x17a   : > { %v3752_v50 = vpop.eup %3751 }
 0x17b   : > { %v945_v2 = vmul.f32 %v3752_v50, %v940_v54 }
 0x17d   : > { %v946_v46 = vpack.c.bf16 %v945_v2, %v945_v2 }
 0x17f   : > { %947 = vst [vmem:[%s4520_s21] sm:$0xf] %v946_v46  ;;  %1178 = vmatmul.mubr.bf16.vlgmr.msra.gmra.mxu0 %v946_v46  ;;  %1219 = vmatmul.mubr.bf16.vlgmr.msra.gmra.mxu1 %v946_v46 }
 0x180   : > { %1450 = vmatpush1.bf16.msra.mxu0 %v4243_v6  ;;  %1491 = vmatpush1.bf16.msra.mxu1 %v4249_v8 }
 0x181   : > { %1451 = vmatprep.subr.bf16.mxu0 %v4258_v10  ;;  %1492 = vmatprep.subr.bf16.mxu1 %v4266_v12 }
 0x182   : > { %1481 = vmatprep.mubr.bf16.mxu0 %v4979_v53  ;;  %1522 = vmatprep.mubr.bf16.mxu1 %v4979_v53 }
 0x184   : > { %1452 = vmatpush1.bf16.msra.mxu0 %v4263_v11  ;;  %1493 = vmatpush1.bf16.msra.mxu1 %v4271_v13 }
 0x185   : > { %1453 = vmatprep.subr.bf16.mxu0 %v4278_v15  ;;  %1494 = vmatprep.subr.bf16.mxu1 %v4285_v17 }
 0x188   : > { %1454 = vmatpush1.bf16.msra.mxu0 %v4282_v16  ;;  %1495 = vmatpush1.bf16.msra.mxu1 %v4290_v18 }
 0x189   : > { %1455 = vmatprep.subr.bf16.mxu0 %v4293_v19  ;;  %1496 = vmatprep.subr.bf16.mxu1 %v4299_v20 }
 0x18c   : > { %1456 = vmatpush1.bf16.msra.mxu0 %v4303_v21  ;;  %1497 = vmatpush1.bf16.msra.mxu1 %v4309_v22 }
 0x18d   : > { %1457 = vmatprep.subr.bf16.mxu0 %v4312_v23  ;;  %1498 = vmatprep.subr.bf16.mxu1 %v4317_v24 }
 0x190   : > { %1458 = vmatpush1.bf16.msra.mxu0 %v4322_v26  ;;  %1499 = vmatpush1.bf16.msra.mxu1 %v4327_v27 }
 0x191   : > { %1459 = vmatprep.subr.bf16.mxu0 %v4330_v28  ;;  %1500 = vmatprep.subr.bf16.mxu1 %v4334_v29 }
 0x194   : > { %1460 = vmatpush1.bf16.msra.mxu0 %v4339_v30  ;;  %1501 = vmatpush1.bf16.msra.mxu1 %v4343_v31 }
 0x195   : > { %1461 = vmatprep.subr.bf16.mxu0 %v4350_v33  ;;  %1502 = vmatprep.subr.bf16.mxu1 %v4358_v35 }
 0x198   : > { %1462 = vmatpush1.bf16.msra.mxu0 %v4355_v34  ;;  %1503 = vmatpush1.bf16.msra.mxu1 %v4361_v36 }
 0x199   : > { %1463 = vmatprep.subr.bf16.mxu0 %v4364_v37  ;;  %1504 = vmatprep.subr.bf16.mxu1 %v4368_v38 }
 0x19c   : > { %1464 = vmatpush1.bf16.msra.mxu0 %v4374_v39  ;;  %1505 = vmatpush1.bf16.msra.mxu1 %v4379_v40 }
 0x19d   : > { %1753 = vmatprep.subr.bf16.mxu0 %v4246_v7  ;;  %1794 = vmatprep.subr.bf16.mxu1 %v4253_v9 }
 0x23f   : > { %v1179_v60 = vpop.f32.mrf.mxu0  ;;  %v1220_v1 = vpop.f32.mrf.mxu1 }
 0x240   : > { %v1227_v51 = vadd.f32 %v1179_v60, %v4440_v58  ;;  %v1229_v55 = vadd.f32 %v1220_v1, %v4443_v59 }
 0x241   : > { %v1181_v57 = vpop.f32.mrf.mxu0  ;;  %v1222_v14 = vpop.f32.mrf.mxu1 }
 0x242   : > { %v1231_v45 = vmul.f32 0.5, %v1227_v51  ;;  %v1228_v44 = vadd.f32 %v1181_v57, %v4445_v62  ;;  %v1230_v7 = vadd.f32 %v1222_v14, %v4448_v63 }
 0x243   : > { %v1183_v41 = vpop.f32.mrf.mxu0  ;;  %v1224_v42 = vpop.f32.mrf.mxu1 }
 0x244   : > { %3753 = vtanh.f32 %v1231_v45  ;;  %v1235_v48 = vmul.f32 0.5, %v1228_v44  ;;  %v1240_v9 = vmul.f32 0.5, %v1230_v7  ;;  %v4626_v45 = vld [vmem:[%s4230_s7 + $0xc4] ss:$16 sps:$4 sm:$0xff]   ;;  %v4629_v44 = vld [vmem:[%s4230_s7 + $0xcc] ss:$16 sps:$4 sm:$0xff]  }
 0x245   : > { %v1184_v49 = vpop.f32.mrf.mxu0  ;;  %v1225_v61 = vpop.f32.mrf.mxu1  ;;  %v4632_v41 = vld [vmem:[%s4230_s7 + $0xc0] ss:$16 sps:$4 sm:$0xff]   ;;  %v4635_v42 = vld [vmem:[%s4230_s7 + $0xc8] ss:$16 sps:$4 sm:$0xff]   ;;  %v4658_v7 = vld [vmem:[%s4230_s7 + $0x84] ss:$16 sps:$4 sm:$0xff]  }
 0x246   : > { %3755 = vtanh.f32 %v1235_v48  ;;  %v4645_v48 = vld [vmem:[%s4230_s7 + $0xac] ss:$16 sps:$4 sm:$0xff]   ;;  %v4648_v49 = vld [vmem:[%s4230_s7 + $0xa0] ss:$16 sps:$4 sm:$0xff]   ;;  %v4651_v61 = vld [vmem:[%s4230_s7 + $0xa8] ss:$16 sps:$4 sm:$0xff]  }
 0x247   : > { %3757 = vtanh.f32 %v1229_v55  ;;  %v4642_v55 = vld [vmem:[%s4230_s7 + $0xa4] ss:$16 sps:$4 sm:$0xff]  }
 0x248   : > { %3759 = vtanh.f32 %v1240_v9  ;;  %v4661_v9 = vld [vmem:[%s4230_s7 + $0x8c] ss:$16 sps:$4 sm:$0xff]  }
 0x251   : > { %v3754_v47 = vpop.eup %3753 }
 0x252   : > { %v1233_v58 = vadd.f32 1.0, %v3754_v47  ;;  %v4664_v47 = vld [vmem:[%s4230_s7 + $0x80] ss:$16 sps:$4 sm:$0xff]  }
 0x253   : > { %v3756_v56 = vpop.eup %3755 }
 0x254   : > { %v1234_v52 = vmul.f32 0.5, %v1233_v58  ;;  %v1237_v54 = vadd.f32 1.0, %v3756_v56  ;;  %v3758_v62 = vpop.eup %3757  ;;  %v4667_v58 = vld [vmem:[%s4230_s7 + $0x88] ss:$16 sps:$4 sm:$0xff]   ;;  %v4674_v56 = vld [vmem:[%s4230_s7 + $0x64] ss:$16 sps:$4 sm:$0xff]  }
 0x255   : > { %v3760_v60 = vpop.eup %3759 }
 0x256   : > { %v1238_v50 = vmul.f32 0.5, %v1237_v54  ;;  %v1245_v2 = vmul.f32 %v3758_v62, %v1234_v52  ;;  %v1242_v1 = vadd.f32 1.0, %v3760_v60  ;;  %v4677_v52 = vld [vmem:[%s4230_s7 + $0x6c] ss:$16 sps:$4 sm:$0xff]   ;;  %v4680_v54 = vld [vmem:[%s4230_s7 + $0x60] ss:$16 sps:$4 sm:$0xff]  }
 0x257   : > { %v4683_v62 = vld [vmem:[%s4230_s7 + $0x68] ss:$16 sps:$4 sm:$0xff]   ;;  %v4706_v60 = vld [vmem:[%s4230_s7 + $0x24] ss:$16 sps:$4 sm:$0xff]  }
 0x258   : > { %v1244_v59 = vmul.f32 %v1238_v50, %v4516_v0  ;;  %v1243_v63 = vmul.f32 0.5, %v1242_v1  ;;  %v4619_v0 = vld [vmem:[%s4230_s7 + $0xe8] ss:$16 sps:$4 sm:$0xff]   ;;  %v4690_v50 = vld [vmem:[%s4230_s7 + $0x44] ss:$16 sps:$4 sm:$0xff]  }
 0x259   : > { %v4709_v1 = vld [vmem:[%s4230_s7 + $0x2c] ss:$16 sps:$4 sm:$0xff]  }
 0x25a   : > { %v4562_v46 = vadd.f32 %v1245_v2, %v1244_v59  ;;  %v4693_v2 = vld [vmem:[%s4230_s7 + $0x4c] ss:$16 sps:$4 sm:$0xff]   ;;  %v4696_v59 = vld [vmem:[%s4230_s7 + $0x40] ss:$16 sps:$4 sm:$0xff]  }
 0x25c   : > { %3761 = vtanh.f32 %v4562_v46 }
 0x269   : > { %v3762_v51 = vpop.eup %3761 }
 0x26a   : > { %v1248_v57 = vmul.f32 %v3762_v51, %v1243_v63  ;;  %v4712_v63 = vld [vmem:[%s4230_s7 + $0x20] ss:$16 sps:$4 sm:$0xff]   ;;  %v4715_v51 = vld [vmem:[%s4230_s7 + $0x28] ss:$16 sps:$4 sm:$0xff]  }
 0x26c   : > { %v1249_v14 = vpack.c.bf16 %v1248_v57, %v1248_v57  ;;  %v4722_v57 = vld [vmem:[%s4230_s7 + $0x4] ss:$16 sps:$4 sm:$0xff]  }
 0x26e   : > { %3344 = vst [vmem:[%s4520_s21 + $0x4] sm:$0xf] %v1249_v14  ;;  %1482 = vmatmul.mubr.bf16.vlgmr.msra.gmra.mxu0 %v1249_v14  ;;  %1523 = vmatmul.mubr.bf16.vlgmr.msra.gmra.mxu1 %v1249_v14  ;;  %v4725_v14 = vld [vmem:[%s4230_s7 + $0xc] ss:$16 sps:$4 sm:$0xff]  }
 0x26f   : > { %1754 = vmatpush1.bf16.msra.mxu0 %v4243_v6  ;;  %1795 = vmatpush1.bf16.msra.mxu1 %v4249_v8 }
 0x270   : > { %1755 = vmatprep.subr.bf16.mxu0 %v4258_v10  ;;  %1796 = vmatprep.subr.bf16.mxu1 %v4266_v12 }
 0x271   : > { %1785 = vmatprep.mubr.bf16.mxu0 %v4979_v53  ;;  %1826 = vmatprep.mubr.bf16.mxu1 %v4979_v53 }
 0x273   : > { %1756 = vmatpush1.bf16.msra.mxu0 %v4263_v11  ;;  %1797 = vmatpush1.bf16.msra.mxu1 %v4271_v13 }
 0x274   : > { %1757 = vmatprep.subr.bf16.mxu0 %v4278_v15  ;;  %1798 = vmatprep.subr.bf16.mxu1 %v4285_v17 }
 0x277   : > { %1758 = vmatpush1.bf16.msra.mxu0 %v4282_v16  ;;  %1799 = vmatpush1.bf16.msra.mxu1 %v4290_v18 }
 0x278   : > { %1759 = vmatprep.subr.bf16.mxu0 %v4293_v19  ;;  %1800 = vmatprep.subr.bf16.mxu1 %v4299_v20 }
 0x27b   : > { %1760 = vmatpush1.bf16.msra.mxu0 %v4303_v21  ;;  %1801 = vmatpush1.bf16.msra.mxu1 %v4309_v22 }
 0x27c   : > { %1761 = vmatprep.subr.bf16.mxu0 %v4312_v23  ;;  %1802 = vmatprep.subr.bf16.mxu1 %v4317_v24 }
 0x27f   : > { %1762 = vmatpush1.bf16.msra.mxu0 %v4322_v26  ;;  %1803 = vmatpush1.bf16.msra.mxu1 %v4327_v27 }
 0x280   : > { %1763 = vmatprep.subr.bf16.mxu0 %v4330_v28  ;;  %1804 = vmatprep.subr.bf16.mxu1 %v4334_v29 }
 0x283   : > { %1764 = vmatpush1.bf16.msra.mxu0 %v4339_v30  ;;  %1805 = vmatpush1.bf16.msra.mxu1 %v4343_v31 }
 0x284   : > { %1765 = vmatprep.subr.bf16.mxu0 %v4350_v33  ;;  %1806 = vmatprep.subr.bf16.mxu1 %v4358_v35 }
 0x287   : > { %1766 = vmatpush1.bf16.msra.mxu0 %v4355_v34  ;;  %1807 = vmatpush1.bf16.msra.mxu1 %v4361_v36 }
 0x288   : > { %1767 = vmatprep.subr.bf16.mxu0 %v4364_v37  ;;  %1808 = vmatprep.subr.bf16.mxu1 %v4368_v38 }
 0x28b   : > { %1768 = vmatpush1.bf16.msra.mxu0 %v4374_v39  ;;  %1809 = vmatpush1.bf16.msra.mxu1 %v4379_v40 }
 0x32e   : > { %v1483_v6 = vpop.f32.mrf.mxu0  ;;  %v1524_v8 = vpop.f32.mrf.mxu1 }
 0x32f   : > { %v1531_v10 = vadd.f32 %v1483_v6, %v4450_v3  ;;  %v1533_v18 = vadd.f32 %v1524_v8, %v4453_v4  ;;  %v4610_v4 = vld [vmem:[%s4230_s7 + $0xe4] ss:$16 sps:$4 sm:$0xff]   ;;  %v4728_v6 = vld [vmem:[%s4230_s7] ss:$16 sps:$4 sm:$0xff]   ;;  %v4731_v8 = vld [vmem:[%s4230_s7 + $0x8] ss:$16 sps:$4 sm:$0xff]  }
 0x330   : > { %v1485_v11 = vpop.f32.mrf.mxu0  ;;  %v1526_v12 = vpop.f32.mrf.mxu1  ;;  %2057 = vmatprep.subr.bf16.mxu0 %v4610_v4 }
 0x331   : > { %v1535_v13 = vmul.f32 0.5, %v1531_v10  ;;  %v1532_v15 = vadd.f32 %v1485_v11, %v4455_v25  ;;  %v1534_v22 = vadd.f32 %v1526_v12, %v4458_v32  ;;  %v4613_v25 = vld [vmem:[%s4230_s7 + $0xec] ss:$16 sps:$4 sm:$0xff]   ;;  %v4616_v32 = vld [vmem:[%s4230_s7 + $0xe0] ss:$16 sps:$4 sm:$0xff]  }
 0x332   : > { %v1487_v16 = vpop.f32.mrf.mxu0  ;;  %v1528_v17 = vpop.f32.mrf.mxu1  ;;  %2098 = vmatprep.subr.bf16.mxu1 %v4613_v25 }
 0x333   : > { %3763 = vtanh.f32 %v1535_v13  ;;  %v1539_v19 = vmul.f32 0.5, %v1532_v15  ;;  %v1544_v23 = vmul.f32 0.5, %v1534_v22  ;;  %v4980_v17 = vld [vmem:[#allocation21_spill] sm:$0xff] }
 0x334   : > { %v1488_v20 = vpop.f32.mrf.mxu0  ;;  %v1529_v21 = vpop.f32.mrf.mxu1 }
 0x335   : > { %3765 = vtanh.f32 %v1539_v19  ;;  %v4981_v21 = vld [vmem:[#allocation20_spill] sm:$0xff] }
 0x336   : > { %3767 = vtanh.f32 %v1533_v18 }
 0x337   : > { %3769 = vtanh.f32 %v1544_v23 }
 0x340   : > { %v3764_v24 = vpop.eup %3763 }
 0x341   : > { %v1537_v26 = vadd.f32 1.0, %v3764_v24 }
 0x342   : > { %v3766_v27 = vpop.eup %3765 }
 0x343   : > { %v1538_v28 = vmul.f32 0.5, %v1537_v26  ;;  %v1541_v29 = vadd.f32 1.0, %v3766_v27  ;;  %v3768_v30 = vpop.eup %3767  ;;  %v4982_v27 = vld [vmem:[#allocation22_spill] sm:$0xff] }
 0x344   : > { %v3770_v36 = vpop.eup %3769 }
 0x345   : > { %v1542_v31 = vmul.f32 0.5, %v1541_v29  ;;  %v1549_v33 = vmul.f32 %v3768_v30, %v1538_v28  ;;  %v1546_v37 = vadd.f32 1.0, %v3770_v36 }
 0x347   : > { %v1548_v34 = vmul.f32 %v1542_v31, %v4562_v46  ;;  %v1547_v38 = vmul.f32 0.5, %v1546_v37  ;;  %v4699_v46 = vld [vmem:[%s4230_s7 + $0x48] ss:$16 sps:$4 sm:$0xff]  }
 0x349   : > { %v4603_v35 = vadd.f32 %v1549_v33, %v1548_v34 }
 0x34b   : > { %3771 = vtanh.f32 %v4603_v35 }
 0x358   : > { %v3772_v39 = vpop.eup %3771 }
 0x359   : > { %v1552_v40 = vmul.f32 %v3772_v39, %v1547_v38 }
 0x35b   : > { %v1553_v3 = vpack.c.bf16 %v1552_v40, %v1552_v40 }
 0x35d   : > { %3377 = vst [vmem:[%s4520_s21 + $0x8] sm:$0xf] %v1553_v3  ;;  %1786 = vmatmul.mubr.bf16.vlgmr.msra.gmra.mxu0 %v1553_v3  ;;  %1827 = vmatmul.mubr.bf16.vlgmr.msra.gmra.mxu1 %v1553_v3 }
 0x35e   : > { %2089 = vmatprep.mubr.bf16.mxu0 %v4979_v53  ;;  %2130 = vmatprep.mubr.bf16.mxu1 %v4979_v53 }
 0x35f   : > { %2058 = vmatpush1.bf16.msra.mxu0 %v4616_v32  ;;  %2099 = vmatpush1.bf16.msra.mxu1 %v4619_v0 }
 0x360   : > { %2059 = vmatprep.subr.bf16.mxu0 %v4626_v45  ;;  %2100 = vmatprep.subr.bf16.mxu1 %v4629_v44 }
 0x363   : > { %2060 = vmatpush1.bf16.msra.mxu0 %v4632_v41  ;;  %2101 = vmatpush1.bf16.msra.mxu1 %v4635_v42 }
 0x364   : > { %2061 = vmatprep.subr.bf16.mxu0 %v4642_v55  ;;  %2102 = vmatprep.subr.bf16.mxu1 %v4645_v48 }
 0x367   : > { %2062 = vmatpush1.bf16.msra.mxu0 %v4648_v49  ;;  %2103 = vmatpush1.bf16.msra.mxu1 %v4651_v61 }
 0x368   : > { %2063 = vmatprep.subr.bf16.mxu0 %v4658_v7  ;;  %2104 = vmatprep.subr.bf16.mxu1 %v4661_v9 }
 0x36b   : > { %2064 = vmatpush1.bf16.msra.mxu0 %v4664_v47  ;;  %2105 = vmatpush1.bf16.msra.mxu1 %v4667_v58 }
 0x36c   : > { %2065 = vmatprep.subr.bf16.mxu0 %v4674_v56  ;;  %2106 = vmatprep.subr.bf16.mxu1 %v4677_v52 }
 0x36f   : > { %2066 = vmatpush1.bf16.msra.mxu0 %v4680_v54  ;;  %2107 = vmatpush1.bf16.msra.mxu1 %v4683_v62 }
 0x370   : > { %2067 = vmatprep.subr.bf16.mxu0 %v4690_v50  ;;  %2108 = vmatprep.subr.bf16.mxu1 %v4693_v2 }
 0x373   : > { %2068 = vmatpush1.bf16.msra.mxu0 %v4696_v59  ;;  %2109 = vmatpush1.bf16.msra.mxu1 %v4699_v46 }
 0x374   : > { %2069 = vmatprep.subr.bf16.mxu0 %v4706_v60  ;;  %2110 = vmatprep.subr.bf16.mxu1 %v4709_v1 }
 0x377   : > { %2070 = vmatpush1.bf16.msra.mxu0 %v4712_v63  ;;  %2111 = vmatpush1.bf16.msra.mxu1 %v4715_v51 }
 0x378   : > { %2071 = vmatprep.subr.bf16.mxu0 %v4722_v57  ;;  %2112 = vmatprep.subr.bf16.mxu1 %v4725_v14 }
 0x37b   : > { %2072 = vmatpush1.bf16.msra.mxu0 %v4728_v6  ;;  %2113 = vmatpush1.bf16.msra.mxu1 %v4731_v8 }
 0x37c   : > { %2361 = vmatprep.subr.bf16.mxu0 %v4610_v4  ;;  %2402 = vmatprep.subr.bf16.mxu1 %v4613_v25 }
 0x41d   : > { %v1787_v10 = vpop.f32.mrf.mxu0  ;;  %v1828_v11 = vpop.f32.mrf.mxu1 }
 0x41e   : > { %v1835_v12 = vadd.f32 %v1787_v10, %v4460_v43  ;;  %v1837_v22 = vadd.f32 %v1828_v11, %v4981_v21 }
 0x41f   : > { %v1789_v13 = vpop.f32.mrf.mxu0  ;;  %v1830_v15 = vpop.f32.mrf.mxu1 }
 0x420   : > { %v1839_v16 = vmul.f32 0.5, %v1835_v12  ;;  %v1836_v18 = vadd.f32 %v1789_v13, %v4980_v17  ;;  %v1838_v28 = vadd.f32 %v1830_v15, %v4982_v27  ;;  %v4983_v17 = vld [vmem:[#allocation23_spill] sm:$0xff]  ;;  %v4985_v27 = vld [vmem:[#allocation24_spill] sm:$0xff] }
 0x421   : > { %v1791_v19 = vpop.f32.mrf.mxu0  ;;  %v1832_v20 = vpop.f32.mrf.mxu1 }
 0x422   : > { %3773 = vtanh.f32 %v1839_v16  ;;  %v1843_v23 = vmul.f32 0.5, %v1836_v18  ;;  %v1848_v29 = vmul.f32 0.5, %v1838_v28 }
 0x423   : > { %v1792_v24 = vpop.f32.mrf.mxu0  ;;  %v1833_v26 = vpop.f32.mrf.mxu1 }
 0x424   : > { %3775 = vtanh.f32 %v1843_v23 }
 0x425   : > { %3777 = vtanh.f32 %v1837_v22  ;;  %v4984_v22 = vld [vmem:[#allocation25_spill] sm:$0xff] }
 0x426   : > { %3779 = vtanh.f32 %v1848_v29 }
 0x42f   : > { %v3774_v30 = vpop.eup %3773 }
 0x430   : > { %v1841_v43 = vadd.f32 1.0, %v3774_v30 }
 0x431   : > { %v3776_v31 = vpop.eup %3775 }
 0x432   : > { %v1842_v33 = vmul.f32 0.5, %v1841_v43  ;;  %v1845_v34 = vadd.f32 1.0, %v3776_v31  ;;  %v3778_v36 = vpop.eup %3777  ;;  %v4986_v31 = vld [vmem:[#allocation26_spill] sm:$0xff] }
 0x433   : > { %v3780_v3 = vpop.eup %3779 }
 0x434   : > { %v1846_v37 = vmul.f32 0.5, %v1845_v34  ;;  %v1853_v38 = vmul.f32 %v3778_v36, %v1842_v33  ;;  %v1850_v10 = vadd.f32 1.0, %v3780_v3 }
 0x436   : > { %v1852_v39 = vmul.f32 %v1846_v37, %v4603_v35  ;;  %v1851_v11 = vmul.f32 0.5, %v1850_v10 }
 0x438   : > { %v4744_v40 = vadd.f32 %v1853_v38, %v1852_v39 }
 0x43a   : > { %3781 = vtanh.f32 %v4744_v40 }
 0x447   : > { %v3782_v12 = vpop.eup %3781 }
 0x448   : > { %v1856_v13 = vmul.f32 %v3782_v12, %v1851_v11 }
 0x44a   : > { %v1857_v15 = vpack.c.bf16 %v1856_v13, %v1856_v13 }
 0x44c   : > { %3410 = vst [vmem:[%s4520_s21 + $0xc] sm:$0xf] %v1857_v15  ;;  %2090 = vmatmul.mubr.bf16.vlgmr.msra.gmra.mxu0 %v1857_v15  ;;  %2131 = vmatmul.mubr.bf16.vlgmr.msra.gmra.mxu1 %v1857_v15 }
 0x44d   : > { %2362 = vmatpush1.bf16.msra.mxu0 %v4616_v32  ;;  %2403 = vmatpush1.bf16.msra.mxu1 %v4619_v0 }
 0x44e   : > { %2363 = vmatprep.subr.bf16.mxu0 %v4626_v45  ;;  %2404 = vmatprep.subr.bf16.mxu1 %v4629_v44 }
 0x44f   : > { %2393 = vmatprep.mubr.bf16.mxu0 %v4979_v53  ;;  %2434 = vmatprep.mubr.bf16.mxu1 %v4979_v53 }
 0x451   : > { %2364 = vmatpush1.bf16.msra.mxu0 %v4632_v41  ;;  %2405 = vmatpush1.bf16.msra.mxu1 %v4635_v42 }
 0x452   : > { %2365 = vmatprep.subr.bf16.mxu0 %v4642_v55  ;;  %2406 = vmatprep.subr.bf16.mxu1 %v4645_v48 }
 0x455   : > { %2366 = vmatpush1.bf16.msra.mxu0 %v4648_v49  ;;  %2407 = vmatpush1.bf16.msra.mxu1 %v4651_v61 }
 0x456   : > { %2367 = vmatprep.subr.bf16.mxu0 %v4658_v7  ;;  %2408 = vmatprep.subr.bf16.mxu1 %v4661_v9 }
 0x459   : > { %2368 = vmatpush1.bf16.msra.mxu0 %v4664_v47  ;;  %2409 = vmatpush1.bf16.msra.mxu1 %v4667_v58 }
 0x45a   : > { %2369 = vmatprep.subr.bf16.mxu0 %v4674_v56  ;;  %2410 = vmatprep.subr.bf16.mxu1 %v4677_v52 }
 0x45d   : > { %2370 = vmatpush1.bf16.msra.mxu0 %v4680_v54  ;;  %2411 = vmatpush1.bf16.msra.mxu1 %v4683_v62 }
 0x45e   : > { %2371 = vmatprep.subr.bf16.mxu0 %v4690_v50  ;;  %2412 = vmatprep.subr.bf16.mxu1 %v4693_v2 }
 0x461   : > { %2372 = vmatpush1.bf16.msra.mxu0 %v4696_v59  ;;  %2413 = vmatpush1.bf16.msra.mxu1 %v4699_v46 }
 0x462   : > { %2373 = vmatprep.subr.bf16.mxu0 %v4706_v60  ;;  %2414 = vmatprep.subr.bf16.mxu1 %v4709_v1 }
 0x465   : > { %2374 = vmatpush1.bf16.msra.mxu0 %v4712_v63  ;;  %2415 = vmatpush1.bf16.msra.mxu1 %v4715_v51 }
 0x466   : > { %2375 = vmatprep.subr.bf16.mxu0 %v4722_v57  ;;  %2416 = vmatprep.subr.bf16.mxu1 %v4725_v14 }
 0x469   : > { %2376 = vmatpush1.bf16.msra.mxu0 %v4728_v6  ;;  %2417 = vmatpush1.bf16.msra.mxu1 %v4731_v8 }
 0x46a   : > { %2665 = vmatprep.subr.bf16.mxu0 %v4610_v4  ;;  %2706 = vmatprep.subr.bf16.mxu1 %v4613_v25 }
 0x50c   : > { %v2091_v35 = vpop.f32.mrf.mxu0  ;;  %v2132_v16 = vpop.f32.mrf.mxu1 }
 0x50d   : > { %v2139_v18 = vadd.f32 %v2091_v35, %v4983_v17  ;;  %v2141_v28 = vadd.f32 %v2132_v16, %v4985_v27 }
 0x50e   : > { %v2093_v19 = vpop.f32.mrf.mxu0  ;;  %v2134_v20 = vpop.f32.mrf.mxu1 }
 0x50f   : > { %v2143_v21 = vmul.f32 0.5, %v2139_v18  ;;  %v2140_v23 = vadd.f32 %v2093_v19, %v4984_v22  ;;  %v2142_v33 = vadd.f32 %v2134_v20, %v4986_v31  ;;  %v4987_v22 = vld [vmem:[#allocation27_spill] sm:$0xff]  ;;  %v4989_v31 = vld [vmem:[#allocation28_spill] sm:$0xff] }
 0x510   : > { %v2095_v24 = vpop.f32.mrf.mxu0  ;;  %v2136_v26 = vpop.f32.mrf.mxu1 }
 0x511   : > { %3783 = vtanh.f32 %v2143_v21  ;;  %v2147_v29 = vmul.f32 0.5, %v2140_v23  ;;  %v2152_v34 = vmul.f32 0.5, %v2142_v33 }
 0x512   : > { %v2096_v30 = vpop.f32.mrf.mxu0  ;;  %v2137_v43 = vpop.f32.mrf.mxu1 }
 0x513   : > { %3785 = vtanh.f32 %v2147_v29 }
 0x514   : > { %3787 = vtanh.f32 %v2141_v28  ;;  %v4988_v28 = vld [vmem:[#allocation29_spill] sm:$0xff] }
 0x515   : > { %3789 = vtanh.f32 %v2152_v34 }
 0x51e   : > { %v3784_v36 = vpop.eup %3783 }
 0x51f   : > { %v2145_v37 = vadd.f32 1.0, %v3784_v36 }
 0x520   : > { %v3786_v38 = vpop.eup %3785 }
 0x521   : > { %v2146_v39 = vmul.f32 0.5, %v2145_v37  ;;  %v2149_v3 = vadd.f32 1.0, %v3786_v38  ;;  %v3788_v10 = vpop.eup %3787 }
 0x522   : > { %v3790_v35 = vpop.eup %3789 }
 0x523   : > { %v2150_v11 = vmul.f32 0.5, %v2149_v3  ;;  %v2157_v12 = vmul.f32 %v3788_v10, %v2146_v39  ;;  %v2154_v16 = vadd.f32 1.0, %v3790_v35 }
 0x525   : > { %v2156_v13 = vmul.f32 %v2150_v11, %v4744_v40  ;;  %v2155_v17 = vmul.f32 0.5, %v2154_v16 }
 0x527   : > { %v4787_v15 = vadd.f32 %v2157_v12, %v2156_v13 }
 0x529   : > { %3791 = vtanh.f32 %v4787_v15 }
 0x536   : > { %v3792_v18 = vpop.eup %3791 }
 0x537   : > { %v2160_v19 = vmul.f32 %v3792_v18, %v2155_v17 }
 0x539   : > { %v2161_v20 = vpack.c.bf16 %v2160_v19, %v2160_v19 }
 0x53b   : > { %3443 = vst [vmem:[%s4520_s21 + $0x10] sm:$0xf] %v2161_v20  ;;  %2394 = vmatmul.mubr.bf16.vlgmr.msra.gmra.mxu0 %v2161_v20  ;;  %2435 = vmatmul.mubr.bf16.vlgmr.msra.gmra.mxu1 %v2161_v20 }
 0x53c   : > { %2666 = vmatpush1.bf16.msra.mxu0 %v4616_v32  ;;  %2707 = vmatpush1.bf16.msra.mxu1 %v4619_v0 }
 0x53d   : > { %2667 = vmatprep.subr.bf16.mxu0 %v4626_v45  ;;  %2708 = vmatprep.subr.bf16.mxu1 %v4629_v44 }
 0x53e   : > { %2697 = vmatprep.mubr.bf16.mxu0 %v4979_v53  ;;  %2738 = vmatprep.mubr.bf16.mxu1 %v4979_v53 }
 0x540   : > { %2668 = vmatpush1.bf16.msra.mxu0 %v4632_v41  ;;  %2709 = vmatpush1.bf16.msra.mxu1 %v4635_v42 }
 0x541   : > { %2669 = vmatprep.subr.bf16.mxu0 %v4642_v55  ;;  %2710 = vmatprep.subr.bf16.mxu1 %v4645_v48 }
 0x544   : > { %2670 = vmatpush1.bf16.msra.mxu0 %v4648_v49  ;;  %2711 = vmatpush1.bf16.msra.mxu1 %v4651_v61 }
 0x545   : > { %2671 = vmatprep.subr.bf16.mxu0 %v4658_v7  ;;  %2712 = vmatprep.subr.bf16.mxu1 %v4661_v9 }
 0x548   : > { %2672 = vmatpush1.bf16.msra.mxu0 %v4664_v47  ;;  %2713 = vmatpush1.bf16.msra.mxu1 %v4667_v58 }
 0x549   : > { %2673 = vmatprep.subr.bf16.mxu0 %v4674_v56  ;;  %2714 = vmatprep.subr.bf16.mxu1 %v4677_v52 }
 0x54c   : > { %2674 = vmatpush1.bf16.msra.mxu0 %v4680_v54  ;;  %2715 = vmatpush1.bf16.msra.mxu1 %v4683_v62 }
 0x54d   : > { %2675 = vmatprep.subr.bf16.mxu0 %v4690_v50  ;;  %2716 = vmatprep.subr.bf16.mxu1 %v4693_v2 }
 0x550   : > { %2676 = vmatpush1.bf16.msra.mxu0 %v4696_v59  ;;  %2717 = vmatpush1.bf16.msra.mxu1 %v4699_v46 }
 0x551   : > { %2677 = vmatprep.subr.bf16.mxu0 %v4706_v60  ;;  %2718 = vmatprep.subr.bf16.mxu1 %v4709_v1 }
 0x554   : > { %2678 = vmatpush1.bf16.msra.mxu0 %v4712_v63  ;;  %2719 = vmatpush1.bf16.msra.mxu1 %v4715_v51 }
 0x555   : > { %2679 = vmatprep.subr.bf16.mxu0 %v4722_v57  ;;  %2720 = vmatprep.subr.bf16.mxu1 %v4725_v14 }
 0x558   : > { %2680 = vmatpush1.bf16.msra.mxu0 %v4728_v6  ;;  %2721 = vmatpush1.bf16.msra.mxu1 %v4731_v8 }
 0x559   : > { %2969 = vmatprep.subr.bf16.mxu0 %v4610_v4  ;;  %3010 = vmatprep.subr.bf16.mxu1 %v4613_v25  ;;  %v4990_v4 = vld [vmem:[#allocation30_spill] sm:$0xff] }
 0x5fb   : > { %v2395_v40 = vpop.f32.mrf.mxu0  ;;  %v2436_v21 = vpop.f32.mrf.mxu1 }
 0x5fc   : > { %v2443_v23 = vadd.f32 %v2395_v40, %v4987_v22  ;;  %v2445_v33 = vadd.f32 %v2436_v21, %v4989_v31 }
 0x5fd   : > { %v2397_v24 = vpop.f32.mrf.mxu0  ;;  %v2438_v26 = vpop.f32.mrf.mxu1 }
 0x5fe   : > { %v2447_v27 = vmul.f32 0.5, %v2443_v23  ;;  %v2444_v29 = vadd.f32 %v2397_v24, %v4988_v28  ;;  %v2446_v25 = vadd.f32 %v2438_v26, %v4990_v4 }
 0x5ff   : > { %v2399_v30 = vpop.f32.mrf.mxu0  ;;  %v2440_v43 = vpop.f32.mrf.mxu1 }
 0x600   : > { %3793 = vtanh.f32 %v2447_v27  ;;  %v2451_v34 = vmul.f32 0.5, %v2444_v29  ;;  %v2456_v38 = vmul.f32 0.5, %v2446_v25  ;;  %v4995_v30 = vld [vmem:[#allocation35_spill] sm:$0xff] }
 0x601   : > { %v2400_v36 = vpop.f32.mrf.mxu0  ;;  %v2441_v37 = vpop.f32.mrf.mxu1 }
 0x602   : > { %3795 = vtanh.f32 %v2451_v34  ;;  %v4996_v36 = vld [vmem:[#allocation37_spill] sm:$0xff] }
 0x603   : > { %3797 = vtanh.f32 %v2445_v33 }
 0x604   : > { %3799 = vtanh.f32 %v2456_v38  ;;  %v4997_v38 = vld [vmem:[#allocation36_spill] sm:$0xff] }
 0x60d   : > { %v3794_v39 = vpop.eup %3793 }
 0x60e   : > { %v2449_v3 = vadd.f32 1.0, %v3794_v39 }
 0x60f   : > { %v3796_v10 = vpop.eup %3795 }
 0x610   : > { %v2450_v11 = vmul.f32 0.5, %v2449_v3  ;;  %v2453_v12 = vadd.f32 1.0, %v3796_v10  ;;  %v3798_v13 = vpop.eup %3797 }
 0x611   : > { %v3800_v19 = vpop.eup %3799 }
 0x612   : > { %v2454_v35 = vmul.f32 0.5, %v2453_v12  ;;  %v2461_v16 = vmul.f32 %v3798_v13, %v2450_v11  ;;  %v2458_v20 = vadd.f32 1.0, %v3800_v19 }
 0x614   : > { %v2460_v17 = vmul.f32 %v2454_v35, %v4787_v15  ;;  %v2459_v40 = vmul.f32 0.5, %v2458_v20 }
 0x616   : > { %v4830_v18 = vadd.f32 %v2461_v16, %v2460_v17 }
 0x618   : > { %3801 = vtanh.f32 %v4830_v18 }
 0x625   : > { %v3802_v21 = vpop.eup %3801 }
 0x626   : > { %v2464_v22 = vmul.f32 %v3802_v21, %v2459_v40 }
 0x628   : > { %v2465_v23 = vpack.c.bf16 %v2464_v22, %v2464_v22 }
 0x62a   : > { %3476 = vst [vmem:[%s4520_s21 + $0x14] sm:$0xf] %v2465_v23  ;;  %2698 = vmatmul.mubr.bf16.vlgmr.msra.gmra.mxu0 %v2465_v23  ;;  %2739 = vmatmul.mubr.bf16.vlgmr.msra.gmra.mxu1 %v2465_v23 }
 0x62b   : > { %2970 = vmatpush1.bf16.msra.mxu0 %v4616_v32  ;;  %3011 = vmatpush1.bf16.msra.mxu1 %v4619_v0  ;;  %v4991_v0 = vld [vmem:[#allocation31_spill] sm:$0xff] }
 0x62c   : > { %2971 = vmatprep.subr.bf16.mxu0 %v4626_v45  ;;  %3012 = vmatprep.subr.bf16.mxu1 %v4629_v44 }
 0x62d   : > { %3001 = vmatprep.mubr.bf16.mxu0 %v4979_v53  ;;  %3042 = vmatprep.mubr.bf16.mxu1 %v4979_v53 }
 0x62f   : > { %2972 = vmatpush1.bf16.msra.mxu0 %v4632_v41  ;;  %3013 = vmatpush1.bf16.msra.mxu1 %v4635_v42 }
 0x630   : > { %2973 = vmatprep.subr.bf16.mxu0 %v4642_v55  ;;  %3014 = vmatprep.subr.bf16.mxu1 %v4645_v48  ;;  %v4992_v55 = vld [vmem:[#allocation33_spill] sm:$0xff] }
 0x633   : > { %2974 = vmatpush1.bf16.msra.mxu0 %v4648_v49  ;;  %3015 = vmatpush1.bf16.msra.mxu1 %v4651_v61 }
 0x634   : > { %2975 = vmatprep.subr.bf16.mxu0 %v4658_v7  ;;  %3016 = vmatprep.subr.bf16.mxu1 %v4661_v9  ;;  %v4993_v7 = vld [vmem:[#allocation32_spill] sm:$0xff] }
 0x637   : > { %2976 = vmatpush1.bf16.msra.mxu0 %v4664_v47  ;;  %3017 = vmatpush1.bf16.msra.mxu1 %v4667_v58 }
 0x638   : > { %2977 = vmatprep.subr.bf16.mxu0 %v4674_v56  ;;  %3018 = vmatprep.subr.bf16.mxu1 %v4677_v52  ;;  %v4994_v52 = vld [vmem:[#allocation34_spill] sm:$0xff] }
 0x63b   : > { %2978 = vmatpush1.bf16.msra.mxu0 %v4680_v54  ;;  %3019 = vmatpush1.bf16.msra.mxu1 %v4683_v62 }
 0x63c   : > { %2979 = vmatprep.subr.bf16.mxu0 %v4690_v50  ;;  %3020 = vmatprep.subr.bf16.mxu1 %v4693_v2 }
 0x63f   : > { %2980 = vmatpush1.bf16.msra.mxu0 %v4696_v59  ;;  %3021 = vmatpush1.bf16.msra.mxu1 %v4699_v46 }
 0x640   : > { %2981 = vmatprep.subr.bf16.mxu0 %v4706_v60  ;;  %3022 = vmatprep.subr.bf16.mxu1 %v4709_v1 }
 0x643   : > { %2982 = vmatpush1.bf16.msra.mxu0 %v4712_v63  ;;  %3023 = vmatpush1.bf16.msra.mxu1 %v4715_v51 }
 0x644   : > { %2983 = vmatprep.subr.bf16.mxu0 %v4722_v57  ;;  %3024 = vmatprep.subr.bf16.mxu1 %v4725_v14 }
 0x647   : > { %2984 = vmatpush1.bf16.msra.mxu0 %v4728_v6  ;;  %3025 = vmatpush1.bf16.msra.mxu1 %v4731_v8 }
 0x6ea   : > { %v2699_v53 = vpop.f32.mrf.mxu0  ;;  %v2740_v32 = vpop.f32.mrf.mxu1 }
 0x6eb   : > { %v2747_v45 = vadd.f32 %v2699_v53, %v4991_v0  ;;  %v2749_v9 = vadd.f32 %v2740_v32, %v4993_v7 }
 0x6ec   : > { %v2701_v44 = vpop.f32.mrf.mxu0  ;;  %v2742_v41 = vpop.f32.mrf.mxu1 }
 0x6ed   : > { %v2751_v42 = vmul.f32 0.5, %v2747_v45  ;;  %v2748_v48 = vadd.f32 %v2701_v44, %v4992_v55  ;;  %v2750_v54 = vadd.f32 %v2742_v41, %v4994_v52 }
 0x6ee   : > { %v2703_v49 = vpop.f32.mrf.mxu0  ;;  %v2744_v61 = vpop.f32.mrf.mxu1 }
 0x6ef   : > { %3803 = vtanh.f32 %v2751_v42  ;;  %v2755_v47 = vmul.f32 0.5, %v2748_v48  ;;  %v2760_v62 = vmul.f32 0.5, %v2750_v54 }
 0x6f0   : > { %v2704_v58 = vpop.f32.mrf.mxu0  ;;  %v2745_v56 = vpop.f32.mrf.mxu1 }
 0x6f1   : > { %3805 = vtanh.f32 %v2755_v47 }
 0x6f2   : > { %3807 = vtanh.f32 %v2749_v9 }
 0x6f3   : > { %3809 = vtanh.f32 %v2760_v62 }
 0x6fc   : > { %v3804_v50 = vpop.eup %3803 }
 0x6fd   : > { %v2753_v2 = vadd.f32 1.0, %v3804_v50 }
 0x6fe   : > { %v3806_v59 = vpop.eup %3805 }
 0x6ff   : > { %v2754_v46 = vmul.f32 0.5, %v2753_v2  ;;  %v2757_v60 = vadd.f32 1.0, %v3806_v59  ;;  %v3808_v1 = vpop.eup %3807 }
 0x700   : > { %v3810_v6 = vpop.eup %3809 }
 0x701   : > { %v2758_v63 = vmul.f32 0.5, %v2757_v60  ;;  %v2765_v51 = vmul.f32 %v3808_v1, %v2754_v46  ;;  %v2762_v8 = vadd.f32 1.0, %v3810_v6 }
 0x703   : > { %v2764_v57 = vmul.f32 %v2758_v63, %v4830_v18  ;;  %v2763_v15 = vmul.f32 0.5, %v2762_v8 }
 0x705   : > { %v2766_v14 = vadd.f32 %v2765_v51, %v2764_v57 }
 0x707   : > { %3811 = vtanh.f32 %v2766_v14 }
 0x714   : > { %v3812_v24 = vpop.eup %3811 }
 0x715   : > { %v2768_v26 = vmul.f32 %v3812_v24, %v2763_v15 }
 0x717   : > { %v2769_v27 = vpack.c.bf16 %v2768_v26, %v2768_v26 }
 0x719   : > { %3509 = vst [vmem:[%s4520_s21 + $0x18] sm:$0xf] %v2769_v27  ;;  %3002 = vmatmul.mubr.bf16.vlgmr.msra.gmra.mxu0 %v2769_v27  ;;  %3043 = vmatmul.mubr.bf16.vlgmr.msra.gmra.mxu1 %v2769_v27 }
 0x7d9   : > { %v3003_v28 = vpop.f32.mrf.mxu0  ;;  %v3044_v29 = vpop.f32.mrf.mxu1 }
 0x7da   : > { %v3051_v43 = vadd.f32 %v3003_v28, %v4995_v30  ;;  %v3053_v39 = vadd.f32 %v3044_v29, %v4997_v38 }
 0x7db   : > { %v3005_v31 = vpop.f32.mrf.mxu0  ;;  %v3046_v33 = vpop.f32.mrf.mxu1 }
 0x7dc   : > { %v3055_v34 = vmul.f32 0.5, %v3051_v43  ;;  %v3052_v37 = vadd.f32 %v3005_v31, %v4996_v36  ;;  %v3054_v12 = vadd.f32 %v3046_v33, %v4509_v5 }
 0x7dd   : > { %v3007_v4 = vpop.f32.mrf.mxu0  ;;  %v3048_v25 = vpop.f32.mrf.mxu1 }
 0x7de   : > { %3813 = vtanh.f32 %v3055_v34  ;;  %v3059_v3 = vmul.f32 0.5, %v3052_v37  ;;  %v3064_v13 = vmul.f32 0.5, %v3054_v12 }
 0x7df   : > { %v3008_v10 = vpop.f32.mrf.mxu0  ;;  %v3049_v11 = vpop.f32.mrf.mxu1 }
 0x7e0   : > { %3815 = vtanh.f32 %v3059_v3 }
 0x7e1   : > { %3817 = vtanh.f32 %v3053_v39 }
 0x7e2   : > { %3819 = vtanh.f32 %v3064_v13 }
 0x7eb   : > { %v3814_v35 = vpop.eup %3813 }
 0x7ec   : > { %v3057_v16 = vadd.f32 1.0, %v3814_v35 }
 0x7ed   : > { %v3816_v17 = vpop.eup %3815 }
 0x7ee   : > { %v3058_v18 = vmul.f32 0.5, %v3057_v16  ;;  %v3061_v19 = vadd.f32 1.0, %v3816_v17  ;;  %v3818_v20 = vpop.eup %3817 }
 0x7ef   : > { %v3820_v53 = vpop.eup %3819 }
 0x7f0   : > { %v3062_v40 = vmul.f32 0.5, %v3061_v19  ;;  %v3069_v21 = vmul.f32 %v3818_v20, %v3058_v18  ;;  %v3066_v5 = vadd.f32 1.0, %v3820_v53 }
 0x7f2   : > { %v3068_v22 = vmul.f32 %v3062_v40, %v2766_v14  ;;  %v3067_v32 = vmul.f32 0.5, %v3066_v5 }
 0x7f4   : > { %v3070_v23 = vadd.f32 %v3069_v21, %v3068_v22 }
 0x7f6   : > { %3821 = vtanh.f32 %v3070_v23 }
 0x803   : > { %v3822_v0 = vpop.eup %3821 }
 0x804   : > { %v3072_v45 = vmul.f32 %v3822_v0, %v3067_v32 }
 0x806   : > { %v3073_v44 = vpack.c.bf16 %v3072_v45, %v3072_v45 }
 0x808   : > { %3542 = vst [vmem:[%s4520_s21 + $0x1c] sm:$0xf] %v3073_v44 }
 0x809   : > { %3948 = shalt.err (!%p3945_p6)
}
 0x80a   : > { %s3949_s22 = scalar_lea.hbm %s4881_s13, 512  ;;  %s3953_s8 = scalar_lea.hbm %s4936_s4, 1024 }
 0x80b   : > { %p3950_p7 = scmp.ne.s32.totalorder %s4881_s13, %s3949_s22  ;;  %p3954_p2 = scmp.lt.s32.totalorder %s4881_s13, %s4936_s4 }
 0x80c   : > { %p3955_p8 = scmp.lt.s32.totalorder %s3953_s8, %s3949_s22 }
 0x80d   : > { %p3951_p10 = pnand %p3950_p7, %p4117_p9 }
 0x80e   : > { %p3956_p0 = por %p3955_p8, %p3954_p2 }
 0x80f   : > { %p3952_p13 = pneg %p3951_p10 }
 0x811   : > { %p3957_p1 = pnand %p3956_p0, %p3952_p13 }
 0x813   : > { %3960 = shalt.err (!%p3957_p1)
}
 0x814   : > { %s4035_s24 = smov 64   ;;  %s4036_s26 = smov 4  }
 0x815   : > { %3561 = dma.vmem_to_hbm [thread:$0]  (%p4117_p9), %s4883_s11, 512, %s4881_s13, %s3077_s25, %s4035_s24, %s4035_s24, %s4036_s26  }
 0x816 PF: > { %s4998_s7 = sld [smem:[#allocation17_spill]]  ;;  %s3106_s6 = sand.u32 1, %s4003_s15  }
 0x817   : > { %p3577_p3 = pnand %p3245_p12, %p4124_p11  ;;  %s3107_s17 = scalar_lea.sflag [#allocation5], %s3106_s6 }
 0x819   : > { %p3578_p4 = pneg %p3577_p3 }
 0x81b   : > { %3998 = dma.done.wait (%p3578_p4), %s3107_s17, 512  }
 0x81c   : > { %4000 = vsyncadd (%p3578_p4), %s3107_s17, 4294966784  ;;  %s26_s20 = sadd.s32 1, %s4998_s7   ;;  %s4999_s21 = sld [smem:[#allocation16_spill]] }
 0x81d   : > { %p23_p5 = scmp.ge.s32.totalorder %s26_s20, 4   ;;  %s5000_s17 = sld [smem:[#allocation19_spill]] }
 0x81e   : > { %s5001_s28 = sld [smem:[#allocation18_spill]]  ;;  %s5002_s15 = smov %s4007_s16 }
 0x81f   : > { %s5004_s18 = smov %s4019_s19 }
 0x820   :  { %25 = sbr.rel (!%p23_p5) target bundleno = 13 (0xd), region = 132 }
 0x822   : > { %s5003_s16 = smov %s4999_s21 }
 0x824   : > { %s5005_s19 = smov %s5001_s28 }
 0x825   :  { %3112 = vsyncpa [#allocation4], 1 }
 0x826   :  { %3114 = vsyncpa [#allocation4 + $0x1], 1 }
 0x827   :  { %3115 = vsyncpa [#allocation7], 1 }
 0x828   :  { %3117 = vsyncpa [#allocation7 + $0x1], 1 }
 0x829   :  { %3118 = vsyncpa [#allocation10], 1 }
 0x82a   :  { %3120 = vsyncpa [#allocation10 + $0x1], 1 }
 0x82b   :  { %3121 = vsyncpa [#allocation5], 1 }
 0x82c   :  { %3123 = vsyncpa [#allocation5 + $0x1], 1 }

</bundles_post_ra>
